<compile_context>
chip_gen: v7x
topology: tpu7x:2x2x1
jax: 0.10.0
libtpu: 0.0.40
codegen_flags: <defaults>
</compile_context>

<pallas_src>
import functools

import jax
import jax.numpy as jnp
from jax.experimental import pallas as pl
from jax.experimental.pallas import tpu as pltpu


# ---------------- synthetic hyper-params (stand-in for `params`) -------------
VISION_EMBEDDING_DIM = 8
PROPRIOCEPTION_DIM = 4
LATENT_DIM = 4
ACTION_DIM = 4
NUM_DISTRIBS = 4
LAYER_SIZE = 32            # LSTM hidden size (small for the test)
EPSILON = 1e-4
IN_DIM = 2 * VISION_EMBEDDING_DIM + LATENT_DIM + PROPRIOCEPTION_DIM  # 24
HEAD_DIM = ACTION_DIM * NUM_DISTRIBS                                  # 16
OUT_LANES = ((3 * HEAD_DIM + 127) // 128) * 128                       # 128

B = 2   # batch
T = 8   # sequence length


# ------------------------------- kernel --------------------------------------
def _actor_kernel(x_ref,
                  w1i_ref, b1_ref,
                  wblk_ref, b2_ref,
                  wh_ref, bh_ref,
                  out_ref,
                  *, hidden, batch, seq, head_dim):
    H = hidden
    Bb = batch

    # --- hoisted lstm1 input projection: one (T*B, Din) @ (Din, 4H) matmul ---
    gx = (jnp.dot(x_ref[...], w1i_ref[...], preferred_element_type=jnp.float32)
          + b1_ref[...])                                        # (T*B, 4H)
    # Loop-invariant per-step slices (off the serial data-dependency chain).
    gx_t = [gx[t * Bb:(t + 1) * Bb, :] for t in range(seq)]

    wblk = wblk_ref[...]        # (2H, 8H): [[W1h, W2i], [0, W2h]]
    b2 = b2_ref[...]

    def gates_to_state(g, c):
        # PyTorch gate order: i, f, g, o
        i = jax.nn.sigmoid(g[:, 0 * H:1 * H])
        f = jax.nn.sigmoid(g[:, 1 * H:2 * H])
        gg = jnp.tanh(g[:, 2 * H:3 * H])
        o = jax.nn.sigmoid(g[:, 3 * H:4 * H])
        c_new = f * c + i * gg
        h_new = o * jnp.tanh(c_new)
        return h_new, c_new

    zeros = jnp.zeros((Bb, H), jnp.float32)

    # h1_init == 0  =>  g1(0) = gx(0); no matmul needed for the first step.
    h1, c1 = gates_to_state(gx_t[0], zeros)
    h2, c2 = zeros, zeros

    # Fully-unrolled recurrence; exactly ONE MXU matmul per step on the
    # serial chain; all state lives in vregs.
    h2_steps = []
    for t in range(seq):
        # [h1_t | h2_{t-1}] @ [[W1h, W2i], [0, W2h]]  ->
        #   cols 0:4H  = h1_t @ W1h                  (layer-1 h-part, step t+1)
        #   cols 4H:8H = h1_t @ W2i + h2_{t-1} @ W2h (layer-2 h-part, step t)
        m = jnp.dot(jnp.concatenate([h1, h2], axis=1), wblk,
                    preferred_element_type=jnp.float32)          # (B, 8H)

        h2, c2 = gates_to_state(m[:, 4 * H:8 * H] + b2, c2)
        h2_steps.append(h2)

        if t + 1 < seq:
            g1 = gx_t[t + 1] + m[:, 0:4 * H]
            h1, c1 = gates_to_state(g1, c1)

    # --- fused heads, off the recurrent path: one (T*B, H) @ (H, 128) matmul ---
    h2_all = jnp.concatenate(h2_steps, axis=0)                   # (T*B, H)
    heads = (jnp.dot(h2_all, wh_ref[...],
                     preferred_element_type=jnp.float32)
             + bh_ref[...])                                      # (T*B, 128)

    # Numerically-stable softplus applied only to the sigma third via a lane
    # mask (epsilon already folded into the sigma bias by the wrapper).
    sp = jnp.maximum(heads, 0.0) + jnp.log1p(jnp.exp(-jnp.abs(heads)))
    lane = jax.lax.broadcasted_iota(jnp.int32, heads.shape, 1)
    is_sigma = (lane >= 2 * head_dim) & (lane < 3 * head_dim)
    out_ref[...] = jnp.where(is_sigma, sp, heads)                # unmasked vst


# ------------------------------- wrapper --------------------------------------
def logistic_actor_forward(vision_embeded, proprioception, latent, goal_embeded,
                           weights):
    """Returns (weightings, mu, scale), each (B*T, action_dim, num_distribs).

    These are exactly the parameters the PyTorch module feeds into
    LogisticMixture (the Distribution object itself has no Pallas equivalent).
    """
    x = jnp.concatenate([vision_embeded, proprioception, latent, goal_embeded],
                        axis=-1)                                # (B, T, in_dim)
    Bb, Tt, Din = x.shape
    H = LAYER_SIZE

    # Time-major flat rows: row index = t * B + b.
    x_tm = jnp.transpose(x, (1, 0, 2)).reshape(Tt * Bb, Din)

    (w1i, w1h, b1, w2i, w2h, b2, wa, ba, wm, bm, ws, bs) = weights

    # Cross-layer block weight for the single per-step recurrent matmul:
    #   [h1_t | h2_{t-1}] @ [[W1h, W2i], [0, W2h]]
    w_blk = jnp.concatenate(
        [jnp.concatenate([w1h, w2i], axis=1),
         jnp.concatenate([jnp.zeros_like(w2h), w2h], axis=1)],
        axis=0)                                                 # (2H, 8H)

    # Fuse the three head projections into one (H, 3*HEAD_DIM) matrix, fold
    # epsilon into the sigma bias (exact):
    #   softplus((h + eps) @ ws + bs) == softplus(h @ ws + (bs + eps*sum(ws, 0)))
    # then zero-pad to 128 output lanes for an unmasked store.
    w_heads = jnp.concatenate([wa, wm, ws], axis=1)             # (H, 48)
    b_heads = jnp.concatenate(
        [ba, bm, bs + EPSILON * jnp.sum(ws, axis=0, keepdims=True)],
        axis=1)                                                 # (1, 48)
    pad = OUT_LANES - 3 * HEAD_DIM
    w_heads = jnp.pad(w_heads, ((0, 0), (0, pad)))              # (H, 128)
    b_heads = jnp.pad(b_heads, ((0, 0), (0, pad)))              # (1, 128)

    kernel = functools.partial(_actor_kernel, hidden=H, batch=Bb, seq=Tt,
                               head_dim=HEAD_DIM)
    vmem_spec = pl.BlockSpec(memory_space=pltpu.MemorySpace.VMEM)

    out = pl.pallas_call(
        kernel,
        out_shape=jax.ShapeDtypeStruct((Tt * Bb, OUT_LANES), jnp.float32),
        in_specs=[vmem_spec] * 7,
        out_specs=vmem_spec,
    )(x_tm, w1i, b1, w_blk, b2, w_heads, b_heads)

    # rows ordered t*B + b  ->  batch-major b*T + t (matches PyTorch
    # batch_first followed by .view(-1, action_dim, num_distribs)).
    out48 = out[:, :3 * HEAD_DIM]
    out_bt = jnp.transpose(out48.reshape(Tt, Bb, 3 * HEAD_DIM),
                           (1, 0, 2)).reshape(Bb * Tt, 3 * HEAD_DIM)
    alpha = out_bt[:, 0 * HEAD_DIM:1 * HEAD_DIM].reshape(
        Bb * Tt, ACTION_DIM, NUM_DISTRIBS)
    mu = out_bt[:, 1 * HEAD_DIM:2 * HEAD_DIM].reshape(
        Bb * Tt, ACTION_DIM, NUM_DISTRIBS)
    scale = out_bt[:, 2 * HEAD_DIM:3 * HEAD_DIM].reshape(
        Bb * Tt, ACTION_DIM, NUM_DISTRIBS)
    return alpha, mu, scale


# --------------------------- reference (pure JAX) ------------------------------
def _reference(vision_embeded, proprioception, latent, goal_embeded, weights):
    x = jnp.concatenate([vision_embeded, proprioception, latent, goal_embeded],
                        axis=-1)
    (w1i, w1h, b1, w2i, w2h, b2, wa, ba, wm, bm, ws, bs) = weights
    H = LAYER_SIZE

    def run_lstm(xs, wi, wh, b):
        def step(carry, x_t):
            h, c = carry
            g = x_t @ wi + h @ wh + b[0]
            i = jax.nn.sigmoid(g[:, 0 * H:1 * H])
            f = jax.nn.sigmoid(g[:, 1 * H:2 * H])
            gg = jnp.tanh(g[:, 2 * H:3 * H])
            o = jax.nn.sigmoid(g[:, 3 * H:4 * H])
            c = f * c + i * gg
            h = o * jnp.tanh(c)
            return (h, c), h
        xs_tm = jnp.transpose(xs, (1, 0, 2))
        h0 = jnp.zeros((xs.shape[0], H), jnp.float32)
        _, hs = jax.lax.scan(step, (h0, h0), xs_tm)
        return jnp.transpose(hs, (1, 0, 2))

    h1 = run_lstm(x, w1i, w1h, b1)
    h2 = run_lstm(h1, w2i, w2h, b2)
    alpha = (h2 @ wa + ba[0]).reshape(-1, ACTION_DIM, NUM_DISTRIBS)
    mu = (h2 @ wm + bm[0]).reshape(-1, ACTION_DIM, NUM_DISTRIBS)
    scale = jax.nn.softplus((h2 + EPSILON) @ ws + bs[0]).reshape(
        -1, ACTION_DIM, NUM_DISTRIBS)
    return alpha, mu, scale


# ------------------------------- main ------------------------------------------
if __name__ == "__main__":
    key = jax.random.PRNGKey(0)
    ks = jax.random.split(key, 20)

    def init(k, shape, scale=0.1):
        return (scale * jax.random.normal(k, shape)).astype(jnp.float32)

    H = LAYER_SIZE
    weights = (
        init(ks[0], (IN_DIM, 4 * H)),   # lstm1 W_ih (stored transposed)
        init(ks[1], (H, 4 * H)),        # lstm1 W_hh
        init(ks[2], (1, 4 * H)),        # lstm1 bias (b_ih + b_hh folded)
        init(ks[3], (H, 4 * H)),        # lstm2 W_ih
        init(ks[4], (H, 4 * H)),        # lstm2 W_hh
        init(ks[5], (1, 4 * H)),        # lstm2 bias
        init(ks[6], (H, HEAD_DIM)),     # alpha
        init(ks[7], (1, HEAD_DIM)),
        init(ks[8], (H, HEAD_DIM)),     # mu
        init(ks[9], (1, HEAD_DIM)),
        init(ks[10], (H, HEAD_DIM)),    # sigma
        init(ks[11], (1, HEAD_DIM)),
    )

    vision_embeded = init(ks[12], (B, T, VISION_EMBEDDING_DIM), 1.0)
    proprioception = init(ks[13], (B, T, PROPRIOCEPTION_DIM), 1.0)
    latent = init(ks[14], (B, T, LATENT_DIM), 1.0)
    goal_embeded = init(ks[15], (B, T, VISION_EMBEDDING_DIM), 1.0)

    # TODO(synk): the LogisticMixture Distribution object (sampling / log_prob)
    # has no Pallas equivalent; the kernel returns its parameters
    # (weightings, mu, scale) exactly as the PyTorch forward computes them.
    fwd = jax.jit(logistic_actor_forward)
    alpha, mu, scale = jax.block_until_ready(
        fwd(vision_embeded, proprioception, latent, goal_embeded, weights))

    ra, rm, rs = _reference(vision_embeded, proprioception, latent,
                            goal_embeded, weights)
    assert alpha.shape == (B * T, ACTION_DIM, NUM_DISTRIBS)
    assert jnp.allclose(alpha, ra, atol=1e-5, rtol=1e-5)
    assert jnp.allclose(mu, rm, atol=1e-5, rtol=1e-5)
    assert jnp.allclose(scale, rs, atol=1e-5, rtol=1e-5)

    print("KERNEL_OK")
</pallas_src>

<mosaic_0001>
module attributes {stable_mosaic.version = 11 : i64} {
  func.func @_actor_kernel(%arg0: memref<16x24xf32, #tpu.memory_space<vmem>>, %arg1: memref<24x128xf32, #tpu.memory_space<vmem>>, %arg2: memref<1x128xf32, #tpu.memory_space<vmem>>, %arg3: memref<64x256xf32, #tpu.memory_space<vmem>>, %arg4: memref<1x128xf32, #tpu.memory_space<vmem>>, %arg5: memref<32x128xf32, #tpu.memory_space<vmem>>, %arg6: memref<1x128xf32, #tpu.memory_space<vmem>>, %arg7: memref<16x128xf32, #tpu.memory_space<vmem>>) attributes {dimension_semantics = [], scalar_prefetch = 0 : i64, scratch_operands = 0 : i64, tpu.core_type = #tpu.core_type<tc>} {
    %c0 = arith.constant 0 : index
    %c0_0 = arith.constant 0 : index
    %0 = vector.load %arg0[%c0, %c0_0] : memref<16x24xf32, #tpu.memory_space<vmem>>, vector<16x24xf32>
    %c0_1 = arith.constant 0 : index
    %c0_2 = arith.constant 0 : index
    %1 = vector.load %arg1[%c0_1, %c0_2] : memref<24x128xf32, #tpu.memory_space<vmem>>, vector<24x128xf32>
    %cst = arith.constant dense<0.000000e+00> : vector<16x128xf32>
    %2 = tpu.matmul %0, %1, %cst {dimension_numbers = #tpu.dot_dimension_numbers<[1], [0], [0], [1], [0, 0, 1, 1], [], []>} : vector<16x24xf32>, vector<24x128xf32>, vector<16x128xf32> -> vector<16x128xf32>
    %c0_3 = arith.constant 0 : index
    %c0_4 = arith.constant 0 : index
    %3 = vector.load %arg2[%c0_3, %c0_4] : memref<1x128xf32, #tpu.memory_space<vmem>>, vector<1x128xf32>
    %4 = vector.broadcast %3 : vector<1x128xf32> to vector<16x128xf32>
    %5 = arith.addf %2, %4 : vector<16x128xf32>
    %6 = vector.extract_strided_slice %5 {offsets = [0, 0], sizes = [2, 128], strides = [1, 1]} : vector<16x128xf32> to vector<2x128xf32>
    %7 = vector.extract_strided_slice %5 {offsets = [2, 0], sizes = [2, 128], strides = [1, 1]} : vector<16x128xf32> to vector<2x128xf32>
    %8 = vector.extract_strided_slice %5 {offsets = [4, 0], sizes = [2, 128], strides = [1, 1]} : vector<16x128xf32> to vector<2x128xf32>
    %9 = vector.extract_strided_slice %5 {offsets = [6, 0], sizes = [2, 128], strides = [1, 1]} : vector<16x128xf32> to vector<2x128xf32>
    %10 = vector.extract_strided_slice %5 {offsets = [8, 0], sizes = [2, 128], strides = [1, 1]} : vector<16x128xf32> to vector<2x128xf32>
    %11 = vector.extract_strided_slice %5 {offsets = [10, 0], sizes = [2, 128], strides = [1, 1]} : vector<16x128xf32> to vector<2x128xf32>
    %12 = vector.extract_strided_slice %5 {offsets = [12, 0], sizes = [2, 128], strides = [1, 1]} : vector<16x128xf32> to vector<2x128xf32>
    %13 = vector.extract_strided_slice %5 {offsets = [14, 0], sizes = [2, 128], strides = [1, 1]} : vector<16x128xf32> to vector<2x128xf32>
    %c0_5 = arith.constant 0 : index
    %c0_6 = arith.constant 0 : index
    %14 = vector.load %arg3[%c0_5, %c0_6] : memref<64x256xf32, #tpu.memory_space<vmem>>, vector<64x256xf32>
    %c0_7 = arith.constant 0 : index
    %c0_8 = arith.constant 0 : index
    %15 = vector.load %arg4[%c0_7, %c0_8] : memref<1x128xf32, #tpu.memory_space<vmem>>, vector<1x128xf32>
    %cst_9 = arith.constant 0.000000e+00 : f32
    %16 = vector.broadcast %cst_9 : f32 to vector<2x32xf32>
    %17 = vector.extract_strided_slice %6 {offsets = [0, 0], sizes = [2, 32], strides = [1, 1]} : vector<2x128xf32> to vector<2x32xf32>
    %18 = arith.negf %17 : vector<2x32xf32>
    %19 = math.exp %18 : vector<2x32xf32>
    %cst_10 = arith.constant 1.000000e+00 : f32
    %20 = vector.broadcast %cst_10 : f32 to vector<2x32xf32>
    %21 = arith.addf %20, %19 : vector<2x32xf32>
    %22 = arith.divf %20, %21 : vector<2x32xf32>
    %23 = vector.extract_strided_slice %6 {offsets = [0, 32], sizes = [2, 32], strides = [1, 1]} : vector<2x128xf32> to vector<2x32xf32>
    %24 = arith.negf %23 : vector<2x32xf32>
    %25 = math.exp %24 : vector<2x32xf32>
    %cst_11 = arith.constant 1.000000e+00 : f32
    %26 = vector.broadcast %cst_11 : f32 to vector<2x32xf32>
    %27 = arith.addf %26, %25 : vector<2x32xf32>
    %28 = arith.divf %26, %27 : vector<2x32xf32>
    %29 = vector.extract_strided_slice %6 {offsets = [0, 64], sizes = [2, 32], strides = [1, 1]} : vector<2x128xf32> to vector<2x32xf32>
    %30 = math.tanh %29 : vector<2x32xf32>
    %31 = vector.extract_strided_slice %6 {offsets = [0, 96], sizes = [2, 32], strides = [1, 1]} : vector<2x128xf32> to vector<2x32xf32>
    %32 = arith.negf %31 : vector<2x32xf32>
    %33 = math.exp %32 : vector<2x32xf32>
    %cst_12 = arith.constant 1.000000e+00 : f32
    %34 = vector.broadcast %cst_12 : f32 to vector<2x32xf32>
    %35 = arith.addf %34, %33 : vector<2x32xf32>
    %36 = arith.divf %34, %35 : vector<2x32xf32>
    %37 = arith.mulf %28, %16 : vector<2x32xf32>
    %38 = arith.mulf %22, %30 : vector<2x32xf32>
    %39 = arith.addf %37, %38 : vector<2x32xf32>
    %40 = math.tanh %39 : vector<2x32xf32>
    %41 = arith.mulf %36, %40 : vector<2x32xf32>
    %42 = tpu.concatenate %41, %16 in 1 : vector<2x32xf32>, vector<2x32xf32> -> vector<2x64xf32>
    %cst_13 = arith.constant dense<0.000000e+00> : vector<2x256xf32>
    %43 = tpu.matmul %42, %14, %cst_13 {dimension_numbers = #tpu.dot_dimension_numbers<[1], [0], [0], [1], [0, 0, 1, 1], [], []>} : vector<2x64xf32>, vector<64x256xf32>, vector<2x256xf32> -> vector<2x256xf32>
    %44 = vector.extract_strided_slice %43 {offsets = [0, 128], sizes = [2, 128], strides = [1, 1]} : vector<2x256xf32> to vector<2x128xf32>
    %45 = vector.broadcast %15 : vector<1x128xf32> to vector<2x128xf32>
    %46 = arith.addf %44, %45 : vector<2x128xf32>
    %47 = vector.extract_strided_slice %46 {offsets = [0, 0], sizes = [2, 32], strides = [1, 1]} : vector<2x128xf32> to vector<2x32xf32>
    %48 = arith.negf %47 : vector<2x32xf32>
    %49 = math.exp %48 : vector<2x32xf32>
    %cst_14 = arith.constant 1.000000e+00 : f32
    %50 = vector.broadcast %cst_14 : f32 to vector<2x32xf32>
    %51 = arith.addf %50, %49 : vector<2x32xf32>
    %52 = arith.divf %50, %51 : vector<2x32xf32>
    %53 = vector.extract_strided_slice %46 {offsets = [0, 32], sizes = [2, 32], strides = [1, 1]} : vector<2x128xf32> to vector<2x32xf32>
    %54 = arith.negf %53 : vector<2x32xf32>
    %55 = math.exp %54 : vector<2x32xf32>
    %cst_15 = arith.constant 1.000000e+00 : f32
    %56 = vector.broadcast %cst_15 : f32 to vector<2x32xf32>
    %57 = arith.addf %56, %55 : vector<2x32xf32>
    %58 = arith.divf %56, %57 : vector<2x32xf32>
    %59 = vector.extract_strided_slice %46 {offsets = [0, 64], sizes = [2, 32], strides = [1, 1]} : vector<2x128xf32> to vector<2x32xf32>
    %60 = math.tanh %59 : vector<2x32xf32>
    %61 = vector.extract_strided_slice %46 {offsets = [0, 96], sizes = [2, 32], strides = [1, 1]} : vector<2x128xf32> to vector<2x32xf32>
    %62 = arith.negf %61 : vector<2x32xf32>
    %63 = math.exp %62 : vector<2x32xf32>
    %cst_16 = arith.constant 1.000000e+00 : f32
    %64 = vector.broadcast %cst_16 : f32 to vector<2x32xf32>
    %65 = arith.addf %64, %63 : vector<2x32xf32>
    %66 = arith.divf %64, %65 : vector<2x32xf32>
    %67 = arith.mulf %58, %16 : vector<2x32xf32>
    %68 = arith.mulf %52, %60 : vector<2x32xf32>
    %69 = arith.addf %67, %68 : vector<2x32xf32>
    %70 = math.tanh %69 : vector<2x32xf32>
    %71 = arith.mulf %66, %70 : vector<2x32xf32>
    %72 = vector.extract_strided_slice %43 {offsets = [0, 0], sizes = [2, 128], strides = [1, 1]} : vector<2x256xf32> to vector<2x128xf32>
    %73 = arith.addf %7, %72 : vector<2x128xf32>
    %74 = vector.extract_strided_slice %73 {offsets = [0, 0], sizes = [2, 32], strides = [1, 1]} : vector<2x128xf32> to vector<2x32xf32>
    %75 = arith.negf %74 : vector<2x32xf32>
    %76 = math.exp %75 : vector<2x32xf32>
    %cst_17 = arith.constant 1.000000e+00 : f32
    %77 = vector.broadcast %cst_17 : f32 to vector<2x32xf32>
    %78 = arith.addf %77, %76 : vector<2x32xf32>
    %79 = arith.divf %77, %78 : vector<2x32xf32>
    %80 = vector.extract_strided_slice %73 {offsets = [0, 32], sizes = [2, 32], strides = [1, 1]} : vector<2x128xf32> to vector<2x32xf32>
    %81 = arith.negf %80 : vector<2x32xf32>
    %82 = math.exp %81 : vector<2x32xf32>
    %cst_18 = arith.constant 1.000000e+00 : f32
    %83 = vector.broadcast %cst_18 : f32 to vector<2x32xf32>
    %84 = arith.addf %83, %82 : vector<2x32xf32>
    %85 = arith.divf %83, %84 : vector<2x32xf32>
    %86 = vector.extract_strided_slice %73 {offsets = [0, 64], sizes = [2, 32], strides = [1, 1]} : vector<2x128xf32> to vector<2x32xf32>
    %87 = math.tanh %86 : vector<2x32xf32>
    %88 = vector.extract_strided_slice %73 {offsets = [0, 96], sizes = [2, 32], strides = [1, 1]} : vector<2x128xf32> to vector<2x32xf32>
    %89 = arith.negf %88 : vector<2x32xf32>
    %90 = math.exp %89 : vector<2x32xf32>
    %cst_19 = arith.constant 1.000000e+00 : f32
    %91 = vector.broadcast %cst_19 : f32 to vector<2x32xf32>
    %92 = arith.addf %91, %90 : vector<2x32xf32>
    %93 = arith.divf %91, %92 : vector<2x32xf32>
    %94 = arith.mulf %85, %39 : vector<2x32xf32>
    %95 = arith.mulf %79, %87 : vector<2x32xf32>
    %96 = arith.addf %94, %95 : vector<2x32xf32>
    %97 = math.tanh %96 : vector<2x32xf32>
    %98 = arith.mulf %93, %97 : vector<2x32xf32>
    %99 = tpu.concatenate %98, %71 in 1 : vector<2x32xf32>, vector<2x32xf32> -> vector<2x64xf32>
    %cst_20 = arith.constant dense<0.000000e+00> : vector<2x256xf32>
    %100 = tpu.matmul %99, %14, %cst_20 {dimension_numbers = #tpu.dot_dimension_numbers<[1], [0], [0], [1], [0, 0, 1, 1], [], []>} : vector<2x64xf32>, vector<64x256xf32>, vector<2x256xf32> -> vector<2x256xf32>
    %101 = vector.extract_strided_slice %100 {offsets = [0, 128], sizes = [2, 128], strides = [1, 1]} : vector<2x256xf32> to vector<2x128xf32>
    %102 = vector.broadcast %15 : vector<1x128xf32> to vector<2x128xf32>
    %103 = arith.addf %101, %102 : vector<2x128xf32>
    %104 = vector.extract_strided_slice %103 {offsets = [0, 0], sizes = [2, 32], strides = [1, 1]} : vector<2x128xf32> to vector<2x32xf32>
    %105 = arith.negf %104 : vector<2x32xf32>
    %106 = math.exp %105 : vector<2x32xf32>
    %cst_21 = arith.constant 1.000000e+00 : f32
    %107 = vector.broadcast %cst_21 : f32 to vector<2x32xf32>
    %108 = arith.addf %107, %106 : vector<2x32xf32>
    %109 = arith.divf %107, %108 : vector<2x32xf32>
    %110 = vector.extract_strided_slice %103 {offsets = [0, 32], sizes = [2, 32], strides = [1, 1]} : vector<2x128xf32> to vector<2x32xf32>
    %111 = arith.negf %110 : vector<2x32xf32>
    %112 = math.exp %111 : vector<2x32xf32>
    %cst_22 = arith.constant 1.000000e+00 : f32
    %113 = vector.broadcast %cst_22 : f32 to vector<2x32xf32>
    %114 = arith.addf %113, %112 : vector<2x32xf32>
    %115 = arith.divf %113, %114 : vector<2x32xf32>
    %116 = vector.extract_strided_slice %103 {offsets = [0, 64], sizes = [2, 32], strides = [1, 1]} : vector<2x128xf32> to vector<2x32xf32>
    %117 = math.tanh %116 : vector<2x32xf32>
    %118 = vector.extract_strided_slice %103 {offsets = [0, 96], sizes = [2, 32], strides = [1, 1]} : vector<2x128xf32> to vector<2x32xf32>
    %119 = arith.negf %118 : vector<2x32xf32>
    %120 = math.exp %119 : vector<2x32xf32>
    %cst_23 = arith.constant 1.000000e+00 : f32
    %121 = vector.broadcast %cst_23 : f32 to vector<2x32xf32>
    %122 = arith.addf %121, %120 : vector<2x32xf32>
    %123 = arith.divf %121, %122 : vector<2x32xf32>
    %124 = arith.mulf %115, %69 : vector<2x32xf32>
    %125 = arith.mulf %109, %117 : vector<2x32xf32>
    %126 = arith.addf %124, %125 : vector<2x32xf32>
    %127 = math.tanh %126 : vector<2x32xf32>
    %128 = arith.mulf %123, %127 : vector<2x32xf32>
    %129 = vector.extract_strided_slice %100 {offsets = [0, 0], sizes = [2, 128], strides = [1, 1]} : vector<2x256xf32> to vector<2x128xf32>
    %130 = arith.addf %8, %129 : vector<2x128xf32>
    %131 = vector.extract_strided_slice %130 {offsets = [0, 0], sizes = [2, 32], strides = [1, 1]} : vector<2x128xf32> to vector<2x32xf32>
    %132 = arith.negf %131 : vector<2x32xf32>
    %133 = math.exp %132 : vector<2x32xf32>
    %cst_24 = arith.constant 1.000000e+00 : f32
    %134 = vector.broadcast %cst_24 : f32 to vector<2x32xf32>
    %135 = arith.addf %134, %133 : vector<2x32xf32>
    %136 = arith.divf %134, %135 : vector<2x32xf32>
    %137 = vector.extract_strided_slice %130 {offsets = [0, 32], sizes = [2, 32], strides = [1, 1]} : vector<2x128xf32> to vector<2x32xf32>
    %138 = arith.negf %137 : vector<2x32xf32>
    %139 = math.exp %138 : vector<2x32xf32>
    %cst_25 = arith.constant 1.000000e+00 : f32
    %140 = vector.broadcast %cst_25 : f32 to vector<2x32xf32>
    %141 = arith.addf %140, %139 : vector<2x32xf32>
    %142 = arith.divf %140, %141 : vector<2x32xf32>
    %143 = vector.extract_strided_slice %130 {offsets = [0, 64], sizes = [2, 32], strides = [1, 1]} : vector<2x128xf32> to vector<2x32xf32>
    %144 = math.tanh %143 : vector<2x32xf32>
    %145 = vector.extract_strided_slice %130 {offsets = [0, 96], sizes = [2, 32], strides = [1, 1]} : vector<2x128xf32> to vector<2x32xf32>
    %146 = arith.negf %145 : vector<2x32xf32>
    %147 = math.exp %146 : vector<2x32xf32>
    %cst_26 = arith.constant 1.000000e+00 : f32
    %148 = vector.broadcast %cst_26 : f32 to vector<2x32xf32>
    %149 = arith.addf %148, %147 : vector<2x32xf32>
    %150 = arith.divf %148, %149 : vector<2x32xf32>
    %151 = arith.mulf %142, %96 : vector<2x32xf32>
    %152 = arith.mulf %136, %144 : vector<2x32xf32>
    %153 = arith.addf %151, %152 : vector<2x32xf32>
    %154 = math.tanh %153 : vector<2x32xf32>
    %155 = arith.mulf %150, %154 : vector<2x32xf32>
    %156 = tpu.concatenate %155, %128 in 1 : vector<2x32xf32>, vector<2x32xf32> -> vector<2x64xf32>
    %cst_27 = arith.constant dense<0.000000e+00> : vector<2x256xf32>
    %157 = tpu.matmul %156, %14, %cst_27 {dimension_numbers = #tpu.dot_dimension_numbers<[1], [0], [0], [1], [0, 0, 1, 1], [], []>} : vector<2x64xf32>, vector<64x256xf32>, vector<2x256xf32> -> vector<2x256xf32>
    %158 = vector.extract_strided_slice %157 {offsets = [0, 128], sizes = [2, 128], strides = [1, 1]} : vector<2x256xf32> to vector<2x128xf32>
    %159 = vector.broadcast %15 : vector<1x128xf32> to vector<2x128xf32>
    %160 = arith.addf %158, %159 : vector<2x128xf32>
    %161 = vector.extract_strided_slice %160 {offsets = [0, 0], sizes = [2, 32], strides = [1, 1]} : vector<2x128xf32> to vector<2x32xf32>
    %162 = arith.negf %161 : vector<2x32xf32>
    %163 = math.exp %162 : vector<2x32xf32>
    %cst_28 = arith.constant 1.000000e+00 : f32
    %164 = vector.broadcast %cst_28 : f32 to vector<2x32xf32>
    %165 = arith.addf %164, %163 : vector<2x32xf32>
    %166 = arith.divf %164, %165 : vector<2x32xf32>
    %167 = vector.extract_strided_slice %160 {offsets = [0, 32], sizes = [2, 32], strides = [1, 1]} : vector<2x128xf32> to vector<2x32xf32>
    %168 = arith.negf %167 : vector<2x32xf32>
    %169 = math.exp %168 : vector<2x32xf32>
    %cst_29 = arith.constant 1.000000e+00 : f32
    %170 = vector.broadcast %cst_29 : f32 to vector<2x32xf32>
    %171 = arith.addf %170, %169 : vector<2x32xf32>
    %172 = arith.divf %170, %171 : vector<2x32xf32>
    %173 = vector.extract_strided_slice %160 {offsets = [0, 64], sizes = [2, 32], strides = [1, 1]} : vector<2x128xf32> to vector<2x32xf32>
    %174 = math.tanh %173 : vector<2x32xf32>
    %175 = vector.extract_strided_slice %160 {offsets = [0, 96], sizes = [2, 32], strides = [1, 1]} : vector<2x128xf32> to vector<2x32xf32>
    %176 = arith.negf %175 : vector<2x32xf32>
    %177 = math.exp %176 : vector<2x32xf32>
    %cst_30 = arith.constant 1.000000e+00 : f32
    %178 = vector.broadcast %cst_30 : f32 to vector<2x32xf32>
    %179 = arith.addf %178, %177 : vector<2x32xf32>
    %180 = arith.divf %178, %179 : vector<2x32xf32>
    %181 = arith.mulf %172, %126 : vector<2x32xf32>
    %182 = arith.mulf %166, %174 : vector<2x32xf32>
    %183 = arith.addf %181, %182 : vector<2x32xf32>
    %184 = math.tanh %183 : vector<2x32xf32>
    %185 = arith.mulf %180, %184 : vector<2x32xf32>
    %186 = vector.extract_strided_slice %157 {offsets = [0, 0], sizes = [2, 128], strides = [1, 1]} : vector<2x256xf32> to vector<2x128xf32>
    %187 = arith.addf %9, %186 : vector<2x128xf32>
    %188 = vector.extract_strided_slice %187 {offsets = [0, 0], sizes = [2, 32], strides = [1, 1]} : vector<2x128xf32> to vector<2x32xf32>
    %189 = arith.negf %188 : vector<2x32xf32>
    %190 = math.exp %189 : vector<2x32xf32>
    %cst_31 = arith.constant 1.000000e+00 : f32
    %191 = vector.broadcast %cst_31 : f32 to vector<2x32xf32>
    %192 = arith.addf %191, %190 : vector<2x32xf32>
    %193 = arith.divf %191, %192 : vector<2x32xf32>
    %194 = vector.extract_strided_slice %187 {offsets = [0, 32], sizes = [2, 32], strides = [1, 1]} : vector<2x128xf32> to vector<2x32xf32>
    %195 = arith.negf %194 : vector<2x32xf32>
    %196 = math.exp %195 : vector<2x32xf32>
    %cst_32 = arith.constant 1.000000e+00 : f32
    %197 = vector.broadcast %cst_32 : f32 to vector<2x32xf32>
    %198 = arith.addf %197, %196 : vector<2x32xf32>
    %199 = arith.divf %197, %198 : vector<2x32xf32>
    %200 = vector.extract_strided_slice %187 {offsets = [0, 64], sizes = [2, 32], strides = [1, 1]} : vector<2x128xf32> to vector<2x32xf32>
    %201 = math.tanh %200 : vector<2x32xf32>
    %202 = vector.extract_strided_slice %187 {offsets = [0, 96], sizes = [2, 32], strides = [1, 1]} : vector<2x128xf32> to vector<2x32xf32>
    %203 = arith.negf %202 : vector<2x32xf32>
    %204 = math.exp %203 : vector<2x32xf32>
    %cst_33 = arith.constant 1.000000e+00 : f32
    %205 = vector.broadcast %cst_33 : f32 to vector<2x32xf32>
    %206 = arith.addf %205, %204 : vector<2x32xf32>
    %207 = arith.divf %205, %206 : vector<2x32xf32>
    %208 = arith.mulf %199, %153 : vector<2x32xf32>
    %209 = arith.mulf %193, %201 : vector<2x32xf32>
    %210 = arith.addf %208, %209 : vector<2x32xf32>
    %211 = math.tanh %210 : vector<2x32xf32>
    %212 = arith.mulf %207, %211 : vector<2x32xf32>
    %213 = tpu.concatenate %212, %185 in 1 : vector<2x32xf32>, vector<2x32xf32> -> vector<2x64xf32>
    %cst_34 = arith.constant dense<0.000000e+00> : vector<2x256xf32>
    %214 = tpu.matmul %213, %14, %cst_34 {dimension_numbers = #tpu.dot_dimension_numbers<[1], [0], [0], [1], [0, 0, 1, 1], [], []>} : vector<2x64xf32>, vector<64x256xf32>, vector<2x256xf32> -> vector<2x256xf32>
    %215 = vector.extract_strided_slice %214 {offsets = [0, 128], sizes = [2, 128], strides = [1, 1]} : vector<2x256xf32> to vector<2x128xf32>
    %216 = vector.broadcast %15 : vector<1x128xf32> to vector<2x128xf32>
    %217 = arith.addf %215, %216 : vector<2x128xf32>
    %218 = vector.extract_strided_slice %217 {offsets = [0, 0], sizes = [2, 32], strides = [1, 1]} : vector<2x128xf32> to vector<2x32xf32>
    %219 = arith.negf %218 : vector<2x32xf32>
    %220 = math.exp %219 : vector<2x32xf32>
    %cst_35 = arith.constant 1.000000e+00 : f32
    %221 = vector.broadcast %cst_35 : f32 to vector<2x32xf32>
    %222 = arith.addf %221, %220 : vector<2x32xf32>
    %223 = arith.divf %221, %222 : vector<2x32xf32>
    %224 = vector.extract_strided_slice %217 {offsets = [0, 32], sizes = [2, 32], strides = [1, 1]} : vector<2x128xf32> to vector<2x32xf32>
    %225 = arith.negf %224 : vector<2x32xf32>
    %226 = math.exp %225 : vector<2x32xf32>
    %cst_36 = arith.constant 1.000000e+00 : f32
    %227 = vector.broadcast %cst_36 : f32 to vector<2x32xf32>
    %228 = arith.addf %227, %226 : vector<2x32xf32>
    %229 = arith.divf %227, %228 : vector<2x32xf32>
    %230 = vector.extract_strided_slice %217 {offsets = [0, 64], sizes = [2, 32], strides = [1, 1]} : vector<2x128xf32> to vector<2x32xf32>
    %231 = math.tanh %230 : vector<2x32xf32>
    %232 = vector.extract_strided_slice %217 {offsets = [0, 96], sizes = [2, 32], strides = [1, 1]} : vector<2x128xf32> to vector<2x32xf32>
    %233 = arith.negf %232 : vector<2x32xf32>
    %234 = math.exp %233 : vector<2x32xf32>
    %cst_37 = arith.constant 1.000000e+00 : f32
    %235 = vector.broadcast %cst_37 : f32 to vector<2x32xf32>
    %236 = arith.addf %235, %234 : vector<2x32xf32>
    %237 = arith.divf %235, %236 : vector<2x32xf32>
    %238 = arith.mulf %229, %183 : vector<2x32xf32>
    %239 = arith.mulf %223, %231 : vector<2x32xf32>
    %240 = arith.addf %238, %239 : vector<2x32xf32>
    %241 = math.tanh %240 : vector<2x32xf32>
    %242 = arith.mulf %237, %241 : vector<2x32xf32>
    %243 = vector.extract_strided_slice %214 {offsets = [0, 0], sizes = [2, 128], strides = [1, 1]} : vector<2x256xf32> to vector<2x128xf32>
    %244 = arith.addf %10, %243 : vector<2x128xf32>
    %245 = vector.extract_strided_slice %244 {offsets = [0, 0], sizes = [2, 32], strides = [1, 1]} : vector<2x128xf32> to vector<2x32xf32>
    %246 = arith.negf %245 : vector<2x32xf32>
    %247 = math.exp %246 : vector<2x32xf32>
    %cst_38 = arith.constant 1.000000e+00 : f32
    %248 = vector.broadcast %cst_38 : f32 to vector<2x32xf32>
    %249 = arith.addf %248, %247 : vector<2x32xf32>
    %250 = arith.divf %248, %249 : vector<2x32xf32>
    %251 = vector.extract_strided_slice %244 {offsets = [0, 32], sizes = [2, 32], strides = [1, 1]} : vector<2x128xf32> to vector<2x32xf32>
    %252 = arith.negf %251 : vector<2x32xf32>
    %253 = math.exp %252 : vector<2x32xf32>
    %cst_39 = arith.constant 1.000000e+00 : f32
    %254 = vector.broadcast %cst_39 : f32 to vector<2x32xf32>
    %255 = arith.addf %254, %253 : vector<2x32xf32>
    %256 = arith.divf %254, %255 : vector<2x32xf32>
    %257 = vector.extract_strided_slice %244 {offsets = [0, 64], sizes = [2, 32], strides = [1, 1]} : vector<2x128xf32> to vector<2x32xf32>
    %258 = math.tanh %257 : vector<2x32xf32>
    %259 = vector.extract_strided_slice %244 {offsets = [0, 96], sizes = [2, 32], strides = [1, 1]} : vector<2x128xf32> to vector<2x32xf32>
    %260 = arith.negf %259 : vector<2x32xf32>
    %261 = math.exp %260 : vector<2x32xf32>
    %cst_40 = arith.constant 1.000000e+00 : f32
    %262 = vector.broadcast %cst_40 : f32 to vector<2x32xf32>
    %263 = arith.addf %262, %261 : vector<2x32xf32>
    %264 = arith.divf %262, %263 : vector<2x32xf32>
    %265 = arith.mulf %256, %210 : vector<2x32xf32>
    %266 = arith.mulf %250, %258 : vector<2x32xf32>
    %267 = arith.addf %265, %266 : vector<2x32xf32>
    %268 = math.tanh %267 : vector<2x32xf32>
    %269 = arith.mulf %264, %268 : vector<2x32xf32>
    %270 = tpu.concatenate %269, %242 in 1 : vector<2x32xf32>, vector<2x32xf32> -> vector<2x64xf32>
    %cst_41 = arith.constant dense<0.000000e+00> : vector<2x256xf32>
    %271 = tpu.matmul %270, %14, %cst_41 {dimension_numbers = #tpu.dot_dimension_numbers<[1], [0], [0], [1], [0, 0, 1, 1], [], []>} : vector<2x64xf32>, vector<64x256xf32>, vector<2x256xf32> -> vector<2x256xf32>
    %272 = vector.extract_strided_slice %271 {offsets = [0, 128], sizes = [2, 128], strides = [1, 1]} : vector<2x256xf32> to vector<2x128xf32>
    %273 = vector.broadcast %15 : vector<1x128xf32> to vector<2x128xf32>
    %274 = arith.addf %272, %273 : vector<2x128xf32>
    %275 = vector.extract_strided_slice %274 {offsets = [0, 0], sizes = [2, 32], strides = [1, 1]} : vector<2x128xf32> to vector<2x32xf32>
    %276 = arith.negf %275 : vector<2x32xf32>
    %277 = math.exp %276 : vector<2x32xf32>
    %cst_42 = arith.constant 1.000000e+00 : f32
    %278 = vector.broadcast %cst_42 : f32 to vector<2x32xf32>
    %279 = arith.addf %278, %277 : vector<2x32xf32>
    %280 = arith.divf %278, %279 : vector<2x32xf32>
    %281 = vector.extract_strided_slice %274 {offsets = [0, 32], sizes = [2, 32], strides = [1, 1]} : vector<2x128xf32> to vector<2x32xf32>
    %282 = arith.negf %281 : vector<2x32xf32>
    %283 = math.exp %282 : vector<2x32xf32>
    %cst_43 = arith.constant 1.000000e+00 : f32
    %284 = vector.broadcast %cst_43 : f32 to vector<2x32xf32>
    %285 = arith.addf %284, %283 : vector<2x32xf32>
    %286 = arith.divf %284, %285 : vector<2x32xf32>
    %287 = vector.extract_strided_slice %274 {offsets = [0, 64], sizes = [2, 32], strides = [1, 1]} : vector<2x128xf32> to vector<2x32xf32>
    %288 = math.tanh %287 : vector<2x32xf32>
    %289 = vector.extract_strided_slice %274 {offsets = [0, 96], sizes = [2, 32], strides = [1, 1]} : vector<2x128xf32> to vector<2x32xf32>
    %290 = arith.negf %289 : vector<2x32xf32>
    %291 = math.exp %290 : vector<2x32xf32>
    %cst_44 = arith.constant 1.000000e+00 : f32
    %292 = vector.broadcast %cst_44 : f32 to vector<2x32xf32>
    %293 = arith.addf %292, %291 : vector<2x32xf32>
    %294 = arith.divf %292, %293 : vector<2x32xf32>
    %295 = arith.mulf %286, %240 : vector<2x32xf32>
    %296 = arith.mulf %280, %288 : vector<2x32xf32>
    %297 = arith.addf %295, %296 : vector<2x32xf32>
    %298 = math.tanh %297 : vector<2x32xf32>
    %299 = arith.mulf %294, %298 : vector<2x32xf32>
    %300 = vector.extract_strided_slice %271 {offsets = [0, 0], sizes = [2, 128], strides = [1, 1]} : vector<2x256xf32> to vector<2x128xf32>
    %301 = arith.addf %11, %300 : vector<2x128xf32>
    %302 = vector.extract_strided_slice %301 {offsets = [0, 0], sizes = [2, 32], strides = [1, 1]} : vector<2x128xf32> to vector<2x32xf32>
    %303 = arith.negf %302 : vector<2x32xf32>
    %304 = math.exp %303 : vector<2x32xf32>
    %cst_45 = arith.constant 1.000000e+00 : f32
    %305 = vector.broadcast %cst_45 : f32 to vector<2x32xf32>
    %306 = arith.addf %305, %304 : vector<2x32xf32>
    %307 = arith.divf %305, %306 : vector<2x32xf32>
    %308 = vector.extract_strided_slice %301 {offsets = [0, 32], sizes = [2, 32], strides = [1, 1]} : vector<2x128xf32> to vector<2x32xf32>
    %309 = arith.negf %308 : vector<2x32xf32>
    %310 = math.exp %309 : vector<2x32xf32>
    %cst_46 = arith.constant 1.000000e+00 : f32
    %311 = vector.broadcast %cst_46 : f32 to vector<2x32xf32>
    %312 = arith.addf %311, %310 : vector<2x32xf32>
    %313 = arith.divf %311, %312 : vector<2x32xf32>
    %314 = vector.extract_strided_slice %301 {offsets = [0, 64], sizes = [2, 32], strides = [1, 1]} : vector<2x128xf32> to vector<2x32xf32>
    %315 = math.tanh %314 : vector<2x32xf32>
    %316 = vector.extract_strided_slice %301 {offsets = [0, 96], sizes = [2, 32], strides = [1, 1]} : vector<2x128xf32> to vector<2x32xf32>
    %317 = arith.negf %316 : vector<2x32xf32>
    %318 = math.exp %317 : vector<2x32xf32>
    %cst_47 = arith.constant 1.000000e+00 : f32
    %319 = vector.broadcast %cst_47 : f32 to vector<2x32xf32>
    %320 = arith.addf %319, %318 : vector<2x32xf32>
    %321 = arith.divf %319, %320 : vector<2x32xf32>
    %322 = arith.mulf %313, %267 : vector<2x32xf32>
    %323 = arith.mulf %307, %315 : vector<2x32xf32>
    %324 = arith.addf %322, %323 : vector<2x32xf32>
    %325 = math.tanh %324 : vector<2x32xf32>
    %326 = arith.mulf %321, %325 : vector<2x32xf32>
    %327 = tpu.concatenate %326, %299 in 1 : vector<2x32xf32>, vector<2x32xf32> -> vector<2x64xf32>
    %cst_48 = arith.constant dense<0.000000e+00> : vector<2x256xf32>
    %328 = tpu.matmul %327, %14, %cst_48 {dimension_numbers = #tpu.dot_dimension_numbers<[1], [0], [0], [1], [0, 0, 1, 1], [], []>} : vector<2x64xf32>, vector<64x256xf32>, vector<2x256xf32> -> vector<2x256xf32>
    %329 = vector.extract_strided_slice %328 {offsets = [0, 128], sizes = [2, 128], strides = [1, 1]} : vector<2x256xf32> to vector<2x128xf32>
    %330 = vector.broadcast %15 : vector<1x128xf32> to vector<2x128xf32>
    %331 = arith.addf %329, %330 : vector<2x128xf32>
    %332 = vector.extract_strided_slice %331 {offsets = [0, 0], sizes = [2, 32], strides = [1, 1]} : vector<2x128xf32> to vector<2x32xf32>
    %333 = arith.negf %332 : vector<2x32xf32>
    %334 = math.exp %333 : vector<2x32xf32>
    %cst_49 = arith.constant 1.000000e+00 : f32
    %335 = vector.broadcast %cst_49 : f32 to vector<2x32xf32>
    %336 = arith.addf %335, %334 : vector<2x32xf32>
    %337 = arith.divf %335, %336 : vector<2x32xf32>
    %338 = vector.extract_strided_slice %331 {offsets = [0, 32], sizes = [2, 32], strides = [1, 1]} : vector<2x128xf32> to vector<2x32xf32>
    %339 = arith.negf %338 : vector<2x32xf32>
    %340 = math.exp %339 : vector<2x32xf32>
    %cst_50 = arith.constant 1.000000e+00 : f32
    %341 = vector.broadcast %cst_50 : f32 to vector<2x32xf32>
    %342 = arith.addf %341, %340 : vector<2x32xf32>
    %343 = arith.divf %341, %342 : vector<2x32xf32>
    %344 = vector.extract_strided_slice %331 {offsets = [0, 64], sizes = [2, 32], strides = [1, 1]} : vector<2x128xf32> to vector<2x32xf32>
    %345 = math.tanh %344 : vector<2x32xf32>
    %346 = vector.extract_strided_slice %331 {offsets = [0, 96], sizes = [2, 32], strides = [1, 1]} : vector<2x128xf32> to vector<2x32xf32>
    %347 = arith.negf %346 : vector<2x32xf32>
    %348 = math.exp %347 : vector<2x32xf32>
    %cst_51 = arith.constant 1.000000e+00 : f32
    %349 = vector.broadcast %cst_51 : f32 to vector<2x32xf32>
    %350 = arith.addf %349, %348 : vector<2x32xf32>
    %351 = arith.divf %349, %350 : vector<2x32xf32>
    %352 = arith.mulf %343, %297 : vector<2x32xf32>
    %353 = arith.mulf %337, %345 : vector<2x32xf32>
    %354 = arith.addf %352, %353 : vector<2x32xf32>
    %355 = math.tanh %354 : vector<2x32xf32>
    %356 = arith.mulf %351, %355 : vector<2x32xf32>
    %357 = vector.extract_strided_slice %328 {offsets = [0, 0], sizes = [2, 128], strides = [1, 1]} : vector<2x256xf32> to vector<2x128xf32>
    %358 = arith.addf %12, %357 : vector<2x128xf32>
    %359 = vector.extract_strided_slice %358 {offsets = [0, 0], sizes = [2, 32], strides = [1, 1]} : vector<2x128xf32> to vector<2x32xf32>
    %360 = arith.negf %359 : vector<2x32xf32>
    %361 = math.exp %360 : vector<2x32xf32>
    %cst_52 = arith.constant 1.000000e+00 : f32
    %362 = vector.broadcast %cst_52 : f32 to vector<2x32xf32>
    %363 = arith.addf %362, %361 : vector<2x32xf32>
    %364 = arith.divf %362, %363 : vector<2x32xf32>
    %365 = vector.extract_strided_slice %358 {offsets = [0, 32], sizes = [2, 32], strides = [1, 1]} : vector<2x128xf32> to vector<2x32xf32>
    %366 = arith.negf %365 : vector<2x32xf32>
    %367 = math.exp %366 : vector<2x32xf32>
    %cst_53 = arith.constant 1.000000e+00 : f32
    %368 = vector.broadcast %cst_53 : f32 to vector<2x32xf32>
    %369 = arith.addf %368, %367 : vector<2x32xf32>
    %370 = arith.divf %368, %369 : vector<2x32xf32>
    %371 = vector.extract_strided_slice %358 {offsets = [0, 64], sizes = [2, 32], strides = [1, 1]} : vector<2x128xf32> to vector<2x32xf32>
    %372 = math.tanh %371 : vector<2x32xf32>
    %373 = vector.extract_strided_slice %358 {offsets = [0, 96], sizes = [2, 32], strides = [1, 1]} : vector<2x128xf32> to vector<2x32xf32>
    %374 = arith.negf %373 : vector<2x32xf32>
    %375 = math.exp %374 : vector<2x32xf32>
    %cst_54 = arith.constant 1.000000e+00 : f32
    %376 = vector.broadcast %cst_54 : f32 to vector<2x32xf32>
    %377 = arith.addf %376, %375 : vector<2x32xf32>
    %378 = arith.divf %376, %377 : vector<2x32xf32>
    %379 = arith.mulf %370, %324 : vector<2x32xf32>
    %380 = arith.mulf %364, %372 : vector<2x32xf32>
    %381 = arith.addf %379, %380 : vector<2x32xf32>
    %382 = math.tanh %381 : vector<2x32xf32>
    %383 = arith.mulf %378, %382 : vector<2x32xf32>
    %384 = tpu.concatenate %383, %356 in 1 : vector<2x32xf32>, vector<2x32xf32> -> vector<2x64xf32>
    %cst_55 = arith.constant dense<0.000000e+00> : vector<2x256xf32>
    %385 = tpu.matmul %384, %14, %cst_55 {dimension_numbers = #tpu.dot_dimension_numbers<[1], [0], [0], [1], [0, 0, 1, 1], [], []>} : vector<2x64xf32>, vector<64x256xf32>, vector<2x256xf32> -> vector<2x256xf32>
    %386 = vector.extract_strided_slice %385 {offsets = [0, 128], sizes = [2, 128], strides = [1, 1]} : vector<2x256xf32> to vector<2x128xf32>
    %387 = vector.broadcast %15 : vector<1x128xf32> to vector<2x128xf32>
    %388 = arith.addf %386, %387 : vector<2x128xf32>
    %389 = vector.extract_strided_slice %388 {offsets = [0, 0], sizes = [2, 32], strides = [1, 1]} : vector<2x128xf32> to vector<2x32xf32>
    %390 = arith.negf %389 : vector<2x32xf32>
    %391 = math.exp %390 : vector<2x32xf32>
    %cst_56 = arith.constant 1.000000e+00 : f32
    %392 = vector.broadcast %cst_56 : f32 to vector<2x32xf32>
    %393 = arith.addf %392, %391 : vector<2x32xf32>
    %394 = arith.divf %392, %393 : vector<2x32xf32>
    %395 = vector.extract_strided_slice %388 {offsets = [0, 32], sizes = [2, 32], strides = [1, 1]} : vector<2x128xf32> to vector<2x32xf32>
    %396 = arith.negf %395 : vector<2x32xf32>
    %397 = math.exp %396 : vector<2x32xf32>
    %cst_57 = arith.constant 1.000000e+00 : f32
    %398 = vector.broadcast %cst_57 : f32 to vector<2x32xf32>
    %399 = arith.addf %398, %397 : vector<2x32xf32>
    %400 = arith.divf %398, %399 : vector<2x32xf32>
    %401 = vector.extract_strided_slice %388 {offsets = [0, 64], sizes = [2, 32], strides = [1, 1]} : vector<2x128xf32> to vector<2x32xf32>
    %402 = math.tanh %401 : vector<2x32xf32>
    %403 = vector.extract_strided_slice %388 {offsets = [0, 96], sizes = [2, 32], strides = [1, 1]} : vector<2x128xf32> to vector<2x32xf32>
    %404 = arith.negf %403 : vector<2x32xf32>
    %405 = math.exp %404 : vector<2x32xf32>
    %cst_58 = arith.constant 1.000000e+00 : f32
    %406 = vector.broadcast %cst_58 : f32 to vector<2x32xf32>
    %407 = arith.addf %406, %405 : vector<2x32xf32>
    %408 = arith.divf %406, %407 : vector<2x32xf32>
    %409 = arith.mulf %400, %354 : vector<2x32xf32>
    %410 = arith.mulf %394, %402 : vector<2x32xf32>
    %411 = arith.addf %409, %410 : vector<2x32xf32>
    %412 = math.tanh %411 : vector<2x32xf32>
    %413 = arith.mulf %408, %412 : vector<2x32xf32>
    %414 = vector.extract_strided_slice %385 {offsets = [0, 0], sizes = [2, 128], strides = [1, 1]} : vector<2x256xf32> to vector<2x128xf32>
    %415 = arith.addf %13, %414 : vector<2x128xf32>
    %416 = vector.extract_strided_slice %415 {offsets = [0, 0], sizes = [2, 32], strides = [1, 1]} : vector<2x128xf32> to vector<2x32xf32>
    %417 = arith.negf %416 : vector<2x32xf32>
    %418 = math.exp %417 : vector<2x32xf32>
    %cst_59 = arith.constant 1.000000e+00 : f32
    %419 = vector.broadcast %cst_59 : f32 to vector<2x32xf32>
    %420 = arith.addf %419, %418 : vector<2x32xf32>
    %421 = arith.divf %419, %420 : vector<2x32xf32>
    %422 = vector.extract_strided_slice %415 {offsets = [0, 32], sizes = [2, 32], strides = [1, 1]} : vector<2x128xf32> to vector<2x32xf32>
    %423 = arith.negf %422 : vector<2x32xf32>
    %424 = math.exp %423 : vector<2x32xf32>
    %cst_60 = arith.constant 1.000000e+00 : f32
    %425 = vector.broadcast %cst_60 : f32 to vector<2x32xf32>
    %426 = arith.addf %425, %424 : vector<2x32xf32>
    %427 = arith.divf %425, %426 : vector<2x32xf32>
    %428 = vector.extract_strided_slice %415 {offsets = [0, 64], sizes = [2, 32], strides = [1, 1]} : vector<2x128xf32> to vector<2x32xf32>
    %429 = math.tanh %428 : vector<2x32xf32>
    %430 = vector.extract_strided_slice %415 {offsets = [0, 96], sizes = [2, 32], strides = [1, 1]} : vector<2x128xf32> to vector<2x32xf32>
    %431 = arith.negf %430 : vector<2x32xf32>
    %432 = math.exp %431 : vector<2x32xf32>
    %cst_61 = arith.constant 1.000000e+00 : f32
    %433 = vector.broadcast %cst_61 : f32 to vector<2x32xf32>
    %434 = arith.addf %433, %432 : vector<2x32xf32>
    %435 = arith.divf %433, %434 : vector<2x32xf32>
    %436 = arith.mulf %427, %381 : vector<2x32xf32>
    %437 = arith.mulf %421, %429 : vector<2x32xf32>
    %438 = arith.addf %436, %437 : vector<2x32xf32>
    %439 = math.tanh %438 : vector<2x32xf32>
    %440 = arith.mulf %435, %439 : vector<2x32xf32>
    %441 = tpu.concatenate %440, %413 in 1 : vector<2x32xf32>, vector<2x32xf32> -> vector<2x64xf32>
    %cst_62 = arith.constant dense<0.000000e+00> : vector<2x256xf32>
    %442 = tpu.matmul %441, %14, %cst_62 {dimension_numbers = #tpu.dot_dimension_numbers<[1], [0], [0], [1], [0, 0, 1, 1], [], []>} : vector<2x64xf32>, vector<64x256xf32>, vector<2x256xf32> -> vector<2x256xf32>
    %443 = vector.extract_strided_slice %442 {offsets = [0, 128], sizes = [2, 128], strides = [1, 1]} : vector<2x256xf32> to vector<2x128xf32>
    %444 = vector.broadcast %15 : vector<1x128xf32> to vector<2x128xf32>
    %445 = arith.addf %443, %444 : vector<2x128xf32>
    %446 = vector.extract_strided_slice %445 {offsets = [0, 0], sizes = [2, 32], strides = [1, 1]} : vector<2x128xf32> to vector<2x32xf32>
    %447 = arith.negf %446 : vector<2x32xf32>
    %448 = math.exp %447 : vector<2x32xf32>
    %cst_63 = arith.constant 1.000000e+00 : f32
    %449 = vector.broadcast %cst_63 : f32 to vector<2x32xf32>
    %450 = arith.addf %449, %448 : vector<2x32xf32>
    %451 = arith.divf %449, %450 : vector<2x32xf32>
    %452 = vector.extract_strided_slice %445 {offsets = [0, 32], sizes = [2, 32], strides = [1, 1]} : vector<2x128xf32> to vector<2x32xf32>
    %453 = arith.negf %452 : vector<2x32xf32>
    %454 = math.exp %453 : vector<2x32xf32>
    %cst_64 = arith.constant 1.000000e+00 : f32
    %455 = vector.broadcast %cst_64 : f32 to vector<2x32xf32>
    %456 = arith.addf %455, %454 : vector<2x32xf32>
    %457 = arith.divf %455, %456 : vector<2x32xf32>
    %458 = vector.extract_strided_slice %445 {offsets = [0, 64], sizes = [2, 32], strides = [1, 1]} : vector<2x128xf32> to vector<2x32xf32>
    %459 = math.tanh %458 : vector<2x32xf32>
    %460 = vector.extract_strided_slice %445 {offsets = [0, 96], sizes = [2, 32], strides = [1, 1]} : vector<2x128xf32> to vector<2x32xf32>
    %461 = arith.negf %460 : vector<2x32xf32>
    %462 = math.exp %461 : vector<2x32xf32>
    %cst_65 = arith.constant 1.000000e+00 : f32
    %463 = vector.broadcast %cst_65 : f32 to vector<2x32xf32>
    %464 = arith.addf %463, %462 : vector<2x32xf32>
    %465 = arith.divf %463, %464 : vector<2x32xf32>
    %466 = arith.mulf %457, %411 : vector<2x32xf32>
    %467 = arith.mulf %451, %459 : vector<2x32xf32>
    %468 = arith.addf %466, %467 : vector<2x32xf32>
    %469 = math.tanh %468 : vector<2x32xf32>
    %470 = arith.mulf %465, %469 : vector<2x32xf32>
    %471 = tpu.concatenate %71, %128, %185, %242, %299, %356, %413, %470 in 0 : vector<2x32xf32>, vector<2x32xf32>, vector<2x32xf32>, vector<2x32xf32>, vector<2x32xf32>, vector<2x32xf32>, vector<2x32xf32>, vector<2x32xf32> -> vector<16x32xf32>
    %c0_66 = arith.constant 0 : index
    %c0_67 = arith.constant 0 : index
    %472 = vector.load %arg5[%c0_66, %c0_67] : memref<32x128xf32, #tpu.memory_space<vmem>>, vector<32x128xf32>
    %cst_68 = arith.constant dense<0.000000e+00> : vector<16x128xf32>
    %473 = tpu.matmul %471, %472, %cst_68 {dimension_numbers = #tpu.dot_dimension_numbers<[1], [0], [0], [1], [0, 0, 1, 1], [], []>} : vector<16x32xf32>, vector<32x128xf32>, vector<16x128xf32> -> vector<16x128xf32>
    %c0_69 = arith.constant 0 : index
    %c0_70 = arith.constant 0 : index
    %474 = vector.load %arg6[%c0_69, %c0_70] : memref<1x128xf32, #tpu.memory_space<vmem>>, vector<1x128xf32>
    %475 = vector.broadcast %474 : vector<1x128xf32> to vector<16x128xf32>
    %476 = arith.addf %473, %475 : vector<16x128xf32>
    %cst_71 = arith.constant 0.000000e+00 : f32
    %477 = vector.broadcast %cst_71 : f32 to vector<16x128xf32>
    %478 = arith.maximumf %476, %477 : vector<16x128xf32>
    %479 = math.absf %476 : vector<16x128xf32>
    %cst_72 = arith.constant 0.000000e+00 : f32
    %480 = vector.broadcast %cst_72 : f32 to vector<16x128xf32>
    %481 = arith.subf %480, %479 : vector<16x128xf32>
    %482 = math.exp %481 : vector<16x128xf32>
    %483 = math.log1p %482 : vector<16x128xf32>
    %484 = arith.addf %478, %483 : vector<16x128xf32>
    %485 = tpu.iota {dimensions = array<i32: 1>} : vector<16x128xi32>
    %c32_i32 = arith.constant 32 : i32
    %486 = vector.broadcast %c32_i32 : i32 to vector<16x128xi32>
    %487 = arith.cmpi sge, %485, %486 : vector<16x128xi32>
    %c48_i32 = arith.constant 48 : i32
    %488 = vector.broadcast %c48_i32 : i32 to vector<16x128xi32>
    %489 = arith.cmpi slt, %485, %488 : vector<16x128xi32>
    %490 = arith.andi %487, %489 : vector<16x128xi1>
    %491 = arith.select %490, %484, %476 : vector<16x128xi1>, vector<16x128xf32>
    %c0_73 = arith.constant 0 : index
    %c0_74 = arith.constant 0 : index
    %492 = vector.load %arg7[%c0_73, %c0_74] : memref<16x128xf32, #tpu.memory_space<vmem>>, vector<16x128xf32>
    tpu.vector_store %arg7[%c0_73, %c0_74], %491 {strides = array<i32>} : memref<16x128xf32, #tpu.memory_space<vmem>>, vector<16x128xf32>,
    return
  }
}

</mosaic_0001>

<bundles_post_ra>
// kernel: logistic_actor_forward.1
= control target key start
LH: loop header
LB: loop body
LE: loop exit
PB: predicated region body
PF: predicated region fallthrough
CT: control target
= control target key end

     0   :  { %vm38_vm0 = vcmask 195584   ;;  %v1758_v46 = vmov 0.0   ;;  %vm165_vm1 = vcmask 261120   ;;  %vm167_vm2 = vcmask 523264   ;;  %s2127_s1 = inlined_call_operand.vmem [shape: f32[24,128], index: 1, kind: input, shape index: {}]   ;;  %s2128_s0 = inlined_call_operand.vmem [shape: f32[16,24], index: 0, kind: input, shape index: {}]   ;;  %s2129_s2 = inlined_call_operand.vmem [shape: f32[1,128], index: 2, kind: input, shape index: {}]   ;;  %s2130_s3 = inlined_call_operand.vmem [shape: f32[64,256], index: 3, kind: input, shape index: {}]   ;;  %s2131_s4 = inlined_call_operand.vmem [shape: f32[1,128], index: 4, kind: input, shape index: {}]   ;;  %s2132_s5 = inlined_call_operand.vmem [shape: f32[32,128], index: 5, kind: input, shape index: {}]   ;;  %s2133_s6 = inlined_call_operand.vmem [shape: f32[1,128], index: 6, kind: input, shape index: {}]   ;;  %s2134_s7 = inlined_call_operand.vmem [shape: f32[16,128], index: 7, kind: output, shape index: {}]  }
   0x1   :  { %v28_v0 = vld [vmem:[%s2127_s1] sm:$0xff]  ;;  %v29_v1 = vld [vmem:[%s2127_s1 + $0x8] sm:$0xff]  ;;  %v30_v4 = vld [vmem:[%s2127_s1 + $0x10] sm:$0xff]  ;;  %s1756_s1 = smov 64   ;;  %235 = vmatprep.mubr.f32.mxu1 %v1758_v46  ;;  %vm1267_vm3 = vcmask 1041408   ;;  %vm1269_vm4 = vcmask 1043456  }
   0x2   :  { %v1477_v2 = vpack.c.bf16 %v29_v1, %v28_v0  ;;  %v26_v3 = vld [vmem:[%s2128_s0] sm:$0xff]  ;;  %v27_v5 = vld [vmem:[%s2128_s0 + $0x8] sm:$0xff]  ;;  %s1757_s0 = smov 32   ;;  %v123_v22 = vld [vmem:[%s2130_s3 + $0x18] sm:$0xff]  ;;  %vm1271_vm5 = vcmask 1045504  }
   0x3   :  { %1463 = vmatprep.mubr.msk.f32.mxu0 %vm38_vm0, %v26_v3  ;;  %v1415_v6 = vld [vmem:[%s2129_s2] ss:$0 sm:$0xff]  ;;  %v121_v21 = vld [vmem:[%s2130_s3 + $0x8] sm:$0xff]  ;;  %v122_v25 = vld [vmem:[%s2130_s3 + $0x10] sm:$0xff] }
   0x4   :  { %1478 = vmatprep.subr.bf16.mxu0 %v1477_v2  ;;  %v120_v23 = vld [vmem:[%s2130_s3] sm:$0xff]  ;;  %v1837_v24 = vpack.c.bf16 %v123_v22, %v121_v21  ;;  %v125_v26 = vld [vmem:[%s2130_s3 + $0x28] sm:$0xff]  ;;  %v127_v27 = vld [vmem:[%s2130_s3 + $0x38] sm:$0xff] }
   0x5   :  { %1480 = vmatpush3.bf16.msra.mxu0 %v1477_v2  ;;  %v1848_v28 = vpack.c.bf16 %v122_v25, %v120_v23  ;;  %v1850_v29 = vpack.c.bf16 %v127_v27, %v125_v26  ;;  %v124_v30 = vld [vmem:[%s2130_s3 + $0x20] sm:$0xff]  ;;  %v126_v31 = vld [vmem:[%s2130_s3 + $0x30] sm:$0xff]  ;;  %v129_v32 = vld [vmem:[%s2130_s3 + $0x48] sm:$0xff] }
   0x6   :  { %1461 = vmatprep.subr.mxu0 %v30_v4  ;;  %1482 = vmatprep.subr.bf16.mxu1 %v1837_v24  ;;  %v131_v33 = vld [vmem:[%s2130_s3 + $0x58] sm:$0xff]  ;;  %v1867_v34 = vpack.c.bf16 %v126_v31, %v124_v30  ;;  %v128_v36 = vld [vmem:[%s2130_s3 + $0x40] sm:$0xff]  ;;  %v130_v37 = vld [vmem:[%s2130_s3 + $0x50] sm:$0xff] }
   0x7   :  { %1484 = vmatpush1.bf16.msra.mxu1 %v1848_v28  ;;  %v1871_v35 = vpack.c.bf16 %v131_v33, %v129_v32  ;;  %v133_v38 = vld [vmem:[%s2130_s3 + $0x68] sm:$0xff]  ;;  %v135_v39 = vld [vmem:[%s2130_s3 + $0x78] sm:$0xff]  ;;  %v1887_v40 = vpack.c.bf16 %v130_v37, %v128_v36  ;;  %v132_v43 = vld [vmem:[%s2130_s3 + $0x60] sm:$0xff] }
   0x8   :  { %1486 = vmatprep.subr.bf16.mxu1 %v1850_v29  ;;  %v1891_v42 = vpack.c.bf16 %v135_v39, %v133_v38  ;;  %v134_v44 = vld [vmem:[%s2130_s3 + $0x70] sm:$0xff]  ;;  %v1928_v51 = vld [vmem:[%s2131_s4] ss:$0 sm:$0xff] }
   0x9   :  { %1462 = vmatpush3.msra.mxu0 %v30_v4  ;;  %v1902_v45 = vpack.c.bf16 %v134_v44, %v132_v43 }
   0xa   :  { %1464 = vmatmul.mubr.msk.f32.vlgmr.msra.gmra.mrb[0].mxu0 %vm38_vm0, %v27_v5  ;;  %1498 = vmatprep.subr.bf16.mxu0 %v1837_v24 }
   0xb   :  { %1500 = vmatpush1.bf16.msra.mxu0 %v1848_v28  ;;  %1488 = vmatpush1.bf16.msra.mxu1 %v1867_v34 }
   0xc   :  { %1502 = vmatprep.subr.bf16.mxu0 %v1850_v29  ;;  %1490 = vmatprep.subr.bf16.mxu1 %v1871_v35 }
   0xd   :  { %382 = vmatprep.mubr.f32.mxu0 %v1758_v46 }
   0xf   :  { %1504 = vmatpush1.bf16.msra.mxu0 %v1867_v34  ;;  %1492 = vmatpush1.bf16.msra.mxu1 %v1887_v40 }
  0x10   :  { %1506 = vmatprep.subr.bf16.mxu0 %v1871_v35  ;;  %1494 = vmatprep.subr.bf16.mxu1 %v1891_v42 }
  0x13   :  { %1508 = vmatpush1.bf16.msra.mxu0 %v1887_v40  ;;  %1496 = vmatpush1.bf16.msra.mxu1 %v1902_v45 }
  0x14   :  { %1510 = vmatprep.subr.bf16.mxu0 %v1891_v42  ;;  %1514 = vmatprep.subr.bf16.mxu1 %v1837_v24 }
  0x17   :  { %1512 = vmatpush1.bf16.msra.mxu0 %v1902_v45 }
  0x18   :  { %1530 = vmatprep.subr.bf16.mxu0 %v1837_v24 }
  0xdd   :  { %v1465_v7 = vpop.f32.mrb[0].mxu0 }
  0xde   :  { %v1817_v8 = vadd.f32 %v1465_v7, %v1415_v6  ;;  %v111_v9 = vpop.f32.mrb[1].mxu0 }
  0xdf   :  { %v1819_v10 = vadd.f32 %v1415_v6, %v111_v9 }
  0xe1   :  { %1620 = vtanh.f32 %v1819_v10  ;;  %v1418_v12 = vmul.f32 -1.442695, %v1819_v10 }
  0xe3   :  { %1622 = vpow2.f32 %v1418_v12 }
  0xeb   :  { %v1621_v11 = vpop.eup %1620 }
  0xec   :  { %146 = vrot.lane.b32.xlu0 %v1621_v11, %s1756_s1 }
  0xed   :  { %v1623_v13 = vpop.eup %1622 }
  0xee   :  { %v140_v14 = vadd.f32 1.0, %v1623_v13 }
  0xf0   :  { %1624 = vrcp.f32 %v140_v14 }
  0xfa   :  { %v1625_v15 = vpop.eup %1624 }
  0xfb   :  { %v144_v18 = vmul.f32 0.0, %v1625_v15 }
 0x15e   :  { %v147_v16 = vpop.permute.xlu0 %146 }
 0x15f   :  { %v149_v17 = vmul.f32 %v1625_v15, %v147_v16 }
 0x161   :  { %151 = vrot.lane.b32.xlu0 %v149_v17, %s1757_s0 }
 0x1d3   :  { %v152_v19 = vpop.permute.xlu0 %151 }
 0x1d4   :  { %v1825_v20 = vadd.f32 %v152_v19, %v144_v18 }
 0x1d6   :  { %1626 = vtanh.f32 %v1825_v20  ;;  %v285_v7 = vrot.slane %v1825_v20, 6 }
 0x1e0   :  { %v1627_v41 = vpop.eup %1626 }
 0x1e1   :  { %157 = vrot.lane.b32.xlu1 %v1627_v41, %s1756_s1 }
 0x253   :  { %v158_v47 = vpop.permute.xlu1 %157 }
 0x254   :  { %v160_v48 = vmul.f32 %v1625_v15, %v158_v47 }
 0x256   :  { %162 = vrot.lane.b32.xlu1 %v160_v48, %s1757_s0 }
 0x2c8   :  { %v163_v49 = vpop.permute.xlu1 %162 }
 0x2c9   :  { %v166_v50 = vsel %vm165_vm1, %v163_v49, 0.0 }
 0x2ca   :  { %1419 = vmatmul.mubr.msk.f32.vlgmr.msra.gmra.mrb[0].mxu1 %vm167_vm2, %v166_v50 }
 0x2cb   :  { %1516 = vmatpush1.bf16.msra.mxu1 %v1848_v28  ;;  %523 = vmatprep.mubr.f32.mxu1 %v1758_v46 }
 0x2cc   :  { %1518 = vmatprep.subr.bf16.mxu1 %v1850_v29 }
 0x2cf   :  { %1520 = vmatpush1.bf16.msra.mxu1 %v1867_v34 }
 0x2d0   :  { %1522 = vmatprep.subr.bf16.mxu1 %v1871_v35 }
 0x2d3   :  { %1524 = vmatpush1.bf16.msra.mxu1 %v1887_v40 }
 0x2d4   :  { %1526 = vmatprep.subr.bf16.mxu1 %v1891_v42 }
 0x2d7   :  { %1528 = vmatpush1.bf16.msra.mxu1 %v1902_v45 }
 0x2d8   :  { %1546 = vmatprep.subr.bf16.mxu1 %v1837_v24 }
 0x39d   :  { %v237_v52 = vpop.f32.mrb[0].mxu1 }
 0x39e   :  { %v274_v53 = vrot.slane %v237_v52, 6  ;;  %v239_v54 = vpop.f32.mrb[1].mxu1 }
 0x39f   :  { %v248_v55 = vadd.f32 %v1928_v51, %v239_v54 }
 0x3a0   :  { %v276_v56 = vadd.f32 %v274_v53, %v1819_v10 }
 0x3a1   :  { %1628 = vtanh.f32 %v248_v55  ;;  %v1421_v59 = vmul.f32 -1.442695, %v248_v55 }
 0x3a2   :  { %1630 = vtanh.f32 %v276_v56  ;;  %v1422_v60 = vmul.f32 -1.442695, %v276_v56 }
 0x3a3   :  { %1632 = vpow2.f32 %v1421_v59 }
 0x3a4   :  { %1634 = vpow2.f32 %v1422_v60 }
 0x3ab   :  { %v1629_v57 = vpop.eup %1628 }
 0x3ac   :  { %v1631_v58 = vpop.eup %1630  ;;  %258 = vrot.lane.b32.xlu0 %v1629_v57, %s1756_s1 }
 0x3ad   :  { %289 = vrot.lane.b32.xlu1 %v1631_v58, %s1756_s1  ;;  %v1633_v61 = vpop.eup %1632 }
 0x3ae   :  { %v1635_v62 = vpop.eup %1634  ;;  %v252_v63 = vadd.f32 1.0, %v1633_v61 }
 0x3af   :  { %v280_v0 = vadd.f32 1.0, %v1635_v62 }
 0x3b0   :  { %1636 = vrcp.f32 %v252_v63 }
 0x3b1   :  { %1638 = vrcp.f32 %v280_v0 }
 0x3ba   :  { %v1637_v1 = vpop.eup %1636 }
 0x3bb   :  { %v1639_v3 = vpop.eup %1638  ;;  %v256_v9 = vmul.f32 0.0, %v1637_v1 }
 0x3bc   :  { %v287_v12 = vmul.f32 %v1639_v3, %v285_v7 }
 0x41e   :  { %v259_v2 = vpop.permute.xlu0 %258 }
 0x41f   :  { %v261_v4 = vmul.f32 %v1637_v1, %v259_v2  ;;  %v290_v5 = vpop.permute.xlu1 %289 }
 0x420   :  { %v292_v6 = vmul.f32 %v1639_v3, %v290_v5 }
 0x421   :  { %263 = vrot.lane.b32.xlu0 %v261_v4, %s1757_s0 }
 0x422   :  { %294 = vrot.lane.b32.xlu1 %v292_v6, %s1757_s0 }
 0x493   :  { %v264_v11 = vpop.permute.xlu0 %263 }
 0x494   :  { %v266_v13 = vadd.f32 %v264_v11, %v256_v9  ;;  %v295_v14 = vpop.permute.xlu1 %294 }
 0x495   :  { %v297_v15 = vadd.f32 %v295_v14, %v287_v12 }
 0x496   :  { %1640 = vtanh.f32 %v266_v13 }
 0x497   :  { %1642 = vtanh.f32 %v297_v15  ;;  %v426_v56 = vrot.slane %v297_v15, 6 }
 0x4a0   :  { %v1641_v16 = vpop.eup %1640 }
 0x4a1   :  { %v1643_v17 = vpop.eup %1642  ;;  %269 = vrot.lane.b32.xlu0 %v1641_v16, %s1756_s1 }
 0x4a2   :  { %300 = vrot.lane.b32.xlu1 %v1643_v17, %s1756_s1 }
 0x513   :  { %v270_v18 = vpop.permute.xlu0 %269 }
 0x514   :  { %v1939_v19 = vmul.f32 %v1637_v1, %v270_v18  ;;  %v301_v21 = vpop.permute.xlu1 %300 }
 0x515   :  { %v303_v22 = vmul.f32 %v1639_v3, %v301_v21 }
 0x516   :  { %v309_v20 = vrot.slane %v1939_v19, 6 }
 0x517   :  { %305 = vrot.lane.b32.xlu0 %v303_v22, %s1757_s0 }
 0x518   :  { %310 = vrot.lane.b32.xlu1 %v309_v20, %s1756_s1 }
 0x589   :  { %v306_v23 = vpop.permute.xlu0 %305 }
 0x58a   :  { %v311_v25 = vpop.permute.xlu1 %310 }
 0x58b   :  { %v313_v26 = vsel %vm165_vm1, %v306_v23, %v311_v25 }
 0x58c   :  { %v315_v27 = vrot.slane %v313_v26, 2 }
 0x58e   :  { %1423 = vmatmul.mubr.msk.f32.vlgmr.msra.gmra.mrb[2].mxu0 %vm167_vm2, %v315_v27 }
 0x58f   :  { %1532 = vmatpush1.bf16.msra.mxu0 %v1848_v28  ;;  %664 = vmatprep.mubr.f32.mxu0 %v1758_v46 }
 0x590   :  { %1534 = vmatprep.subr.bf16.mxu0 %v1850_v29 }
 0x593   :  { %1536 = vmatpush1.bf16.msra.mxu0 %v1867_v34 }
 0x594   :  { %1538 = vmatprep.subr.bf16.mxu0 %v1871_v35 }
 0x597   :  { %1540 = vmatpush1.bf16.msra.mxu0 %v1887_v40 }
 0x598   :  { %1542 = vmatprep.subr.bf16.mxu0 %v1891_v42 }
 0x59b   :  { %1544 = vmatpush1.bf16.msra.mxu0 %v1902_v45 }
 0x59c   :  { %1562 = vmatprep.subr.bf16.mxu0 %v1837_v24 }
 0x661   :  { %v384_v30 = vpop.f32.mrb[2].mxu0 }
 0x662   :  { %v415_v31 = vrot.slane %v384_v30, 4  ;;  %v386_v32 = vpop.f32.mrb[3].mxu0 }
 0x663   :  { %v389_v33 = vadd.f32 %v1928_v51, %v386_v32 }
 0x664   :  { %v417_v36 = vadd.f32 %v415_v31, %v1819_v10 }
 0x665   :  { %1644 = vtanh.f32 %v389_v33  ;;  %v1424_v39 = vmul.f32 -1.442695, %v389_v33 }
 0x666   :  { %1646 = vtanh.f32 %v417_v36  ;;  %v1425_v41 = vmul.f32 -1.442695, %v417_v36 }
 0x667   :  { %1648 = vpow2.f32 %v1424_v39 }
 0x668   :  { %1650 = vpow2.f32 %v1425_v41 }
 0x66f   :  { %v1645_v37 = vpop.eup %1644 }
 0x670   :  { %v1647_v38 = vpop.eup %1646  ;;  %399 = vrot.lane.b32.xlu0 %v1645_v37, %s1756_s1 }
 0x671   :  { %430 = vrot.lane.b32.xlu1 %v1647_v38, %s1756_s1  ;;  %v1649_v43 = vpop.eup %1648 }
 0x672   :  { %v1651_v44 = vpop.eup %1650  ;;  %v393_v47 = vadd.f32 1.0, %v1649_v43 }
 0x673   :  { %v421_v48 = vadd.f32 1.0, %v1651_v44 }
 0x674   :  { %1652 = vrcp.f32 %v393_v47 }
 0x675   :  { %1654 = vrcp.f32 %v421_v48 }
 0x67e   :  { %v1653_v49 = vpop.eup %1652 }
 0x67f   :  { %v1655_v52 = vpop.eup %1654  ;;  %v397_v57 = vmul.f32 %v1653_v49, %v266_v13 }
 0x680   :  { %v428_v59 = vmul.f32 %v1655_v52, %v426_v56 }
 0x6e2   :  { %v400_v50 = vpop.permute.xlu0 %399 }
 0x6e3   :  { %v402_v53 = vmul.f32 %v1653_v49, %v400_v50  ;;  %v431_v54 = vpop.permute.xlu1 %430 }
 0x6e4   :  { %v433_v55 = vmul.f32 %v1655_v52, %v431_v54 }
 0x6e5   :  { %404 = vrot.lane.b32.xlu0 %v402_v53, %s1757_s0 }
 0x6e6   :  { %435 = vrot.lane.b32.xlu1 %v433_v55, %s1757_s0 }
 0x757   :  { %v405_v58 = vpop.permute.xlu0 %404 }
 0x758   :  { %v407_v60 = vadd.f32 %v405_v58, %v397_v57  ;;  %v436_v61 = vpop.permute.xlu1 %435 }
 0x759   :  { %v438_v62 = vadd.f32 %v436_v61, %v428_v59 }
 0x75a   :  { %1656 = vtanh.f32 %v407_v60 }
 0x75b   :  { %1658 = vtanh.f32 %v438_v62  ;;  %v567_v36 = vrot.slane %v438_v62, 6 }
 0x764   :  { %v1657_v63 = vpop.eup %1656 }
 0x765   :  { %v1659_v0 = vpop.eup %1658  ;;  %410 = vrot.lane.b32.xlu0 %v1657_v63, %s1756_s1 }
 0x766   :  { %441 = vrot.lane.b32.xlu1 %v1659_v0, %s1756_s1 }
 0x7d7   :  { %v411_v1 = vpop.permute.xlu0 %410 }
 0x7d8   :  { %v1963_v2 = vmul.f32 %v1653_v49, %v411_v1  ;;  %v442_v3 = vpop.permute.xlu1 %441 }
 0x7d9   :  { %v444_v4 = vmul.f32 %v1655_v52, %v442_v3 }
 0x7da   :  { %v450_v5 = vrot.slane %v1963_v2, 4  ;;  %v1254_v49 = vrot.slane %v1963_v2, 6 }
 0x7db   :  { %446 = vrot.lane.b32.xlu0 %v444_v4, %s1757_s0 }
 0x7dc   :  { %451 = vrot.lane.b32.xlu1 %v450_v5, %s1756_s1  ;;  %v1268_v57 = vsel %vm1267_vm3, %v1939_v19, %v1254_v49 }
 0x84d   :  { %v447_v6 = vpop.permute.xlu0 %446 }
 0x84e   :  { %v452_v7 = vpop.permute.xlu1 %451 }
 0x84f   :  { %v454_v9 = vsel %vm165_vm1, %v447_v6, %v452_v7 }
 0x850   :  { %v456_v11 = vrot.slane %v454_v9, 4 }
 0x852   :  { %1426 = vmatmul.mubr.msk.f32.vlgmr.msra.gmra.mrb[2].mxu1 %vm167_vm2, %v456_v11 }
 0x853   :  { %1548 = vmatpush1.bf16.msra.mxu1 %v1848_v28  ;;  %800 = vmatprep.mubr.f32.mxu1 %v1758_v46 }
 0x854   :  { %1550 = vmatprep.subr.bf16.mxu1 %v1850_v29 }
 0x857   :  { %1552 = vmatpush1.bf16.msra.mxu1 %v1867_v34 }
 0x858   :  { %1554 = vmatprep.subr.bf16.mxu1 %v1871_v35 }
 0x85b   :  { %1556 = vmatpush1.bf16.msra.mxu1 %v1887_v40 }
 0x85c   :  { %1558 = vmatprep.subr.bf16.mxu1 %v1891_v42 }
 0x85f   :  { %1560 = vmatpush1.bf16.msra.mxu1 %v1902_v45 }
 0x860   :  { %1578 = vmatprep.subr.bf16.mxu1 %v1837_v24 }
 0x925   :  { %v525_v12 = vpop.f32.mrb[2].mxu1 }
 0x926   :  { %v556_v13 = vrot.slane %v525_v12, 2  ;;  %v527_v14 = vpop.f32.mrb[3].mxu1 }
 0x927   :  { %v530_v15 = vadd.f32 %v1928_v51, %v527_v14 }
 0x928   :  { %v558_v16 = vadd.f32 %v556_v13, %v1819_v10 }
 0x929   :  { %1660 = vtanh.f32 %v530_v15  ;;  %v1427_v21 = vmul.f32 -1.442695, %v530_v15 }
 0x92a   :  { %1662 = vtanh.f32 %v558_v16  ;;  %v1428_v22 = vmul.f32 -1.442695, %v558_v16 }
 0x92b   :  { %1664 = vpow2.f32 %v1427_v21 }
 0x92c   :  { %1666 = vpow2.f32 %v1428_v22 }
 0x933   :  { %v1661_v17 = vpop.eup %1660 }
 0x934   :  { %v1663_v18 = vpop.eup %1662  ;;  %540 = vrot.lane.b32.xlu0 %v1661_v17, %s1756_s1 }
 0x935   :  { %571 = vrot.lane.b32.xlu1 %v1663_v18, %s1756_s1  ;;  %v1665_v20 = vpop.eup %1664 }
 0x936   :  { %v1667_v23 = vpop.eup %1666  ;;  %v534_v25 = vadd.f32 1.0, %v1665_v20 }
 0x937   :  { %v562_v26 = vadd.f32 1.0, %v1667_v23 }
 0x938   :  { %1668 = vrcp.f32 %v534_v25 }
 0x939   :  { %1670 = vrcp.f32 %v562_v26 }
 0x942   :  { %v1669_v27 = vpop.eup %1668 }
 0x943   :  { %v1671_v30 = vpop.eup %1670  ;;  %v538_v37 = vmul.f32 %v1669_v27, %v407_v60 }
 0x944   :  { %v569_v39 = vmul.f32 %v1671_v30, %v567_v36 }
 0x9a6   :  { %v541_v10 = vpop.permute.xlu0 %540 }
 0x9a7   :  { %v543_v31 = vmul.f32 %v1669_v27, %v541_v10  ;;  %v572_v32 = vpop.permute.xlu1 %571 }
 0x9a8   :  { %v574_v33 = vmul.f32 %v1671_v30, %v572_v32 }
 0x9a9   :  { %545 = vrot.lane.b32.xlu0 %v543_v31, %s1757_s0 }
 0x9aa   :  { %576 = vrot.lane.b32.xlu1 %v574_v33, %s1757_s0 }
 0xa1b   :  { %v546_v38 = vpop.permute.xlu0 %545 }
 0xa1c   :  { %v1985_v41 = vadd.f32 %v546_v38, %v538_v37  ;;  %v577_v43 = vpop.permute.xlu1 %576 }
 0xa1d   :  { %v1987_v44 = vadd.f32 %v577_v43, %v569_v39 }
 0xa1e   :  { %1672 = vtanh.f32 %v1985_v41 }
 0xa1f   :  { %1674 = vtanh.f32 %v1987_v44  ;;  %v705_v17 = vrot.slane %v1987_v44, 6 }
 0xa28   :  { %v1673_v47 = vpop.eup %1672 }
 0xa29   :  { %v1675_v48 = vpop.eup %1674  ;;  %551 = vrot.lane.b32.xlu0 %v1673_v47, %s1756_s1 }
 0xa2a   :  { %582 = vrot.lane.b32.xlu1 %v1675_v48, %s1756_s1 }
 0xa9b   :  { %v552_v50 = vpop.permute.xlu0 %551 }
 0xa9c   :  { %v554_v52 = vmul.f32 %v1669_v27, %v552_v50  ;;  %v583_v53 = vpop.permute.xlu1 %582 }
 0xa9d   :  { %v585_v54 = vmul.f32 %v1671_v30, %v583_v53 }
 0xa9e   :  { %v591_v55 = vrot.slane %v554_v52, 2  ;;  %v1256_v56 = vrot.slane %v554_v52, 4 }
 0xa9f   :  { %587 = vrot.lane.b32.xlu0 %v585_v54, %s1757_s0 }
 0xaa0   :  { %592 = vrot.lane.b32.xlu1 %v591_v55, %s1756_s1  ;;  %v1999_v58 = vsel %vm1269_vm4, %v1268_v57, %v1256_v56 }
 0xb11   :  { %v588_v59 = vpop.permute.xlu0 %587 }
 0xb12   :  { %v593_v60 = vpop.permute.xlu1 %592 }
 0xb13   :  { %v595_v61 = vsel %vm165_vm1, %v588_v59, %v593_v60 }
 0xb14   :  { %v597_v62 = vrot.slane %v595_v61, 6 }
 0xb16   :  { %1429 = vmatmul.mubr.msk.f32.vlgmr.msra.gmra.mrb[4].mxu0 %vm167_vm2, %v597_v62 }
 0xb17   :  { %1564 = vmatpush1.bf16.msra.mxu0 %v1848_v28  ;;  %941 = vmatprep.mubr.f32.mxu0 %v1758_v46 }
 0xb18   :  { %1566 = vmatprep.subr.bf16.mxu0 %v1850_v29 }
 0xb1b   :  { %1568 = vmatpush1.bf16.msra.mxu0 %v1867_v34 }
 0xb1c   :  { %1570 = vmatprep.subr.bf16.mxu0 %v1871_v35 }
 0xb1f   :  { %1572 = vmatpush1.bf16.msra.mxu0 %v1887_v40 }
 0xb20   :  { %1574 = vmatprep.subr.bf16.mxu0 %v1891_v42 }
 0xb23   :  { %1576 = vmatpush1.bf16.msra.mxu0 %v1902_v45 }
 0xb24   :  { %1594 = vmatprep.subr.bf16.mxu0 %v1837_v24 }
 0xbe9   :  { %v666_v19 = vpop.f32.mrb[4].mxu0 }
 0xbea   :  { %v696_v63 = vadd.f32 %v666_v19, %v1817_v8  ;;  %v668_v0 = vpop.f32.mrb[5].mxu0 }
 0xbeb   :  { %v671_v1 = vadd.f32 %v1928_v51, %v668_v0 }
 0xbec   :  { %1676 = vtanh.f32 %v696_v63  ;;  %v1431_v4 = vmul.f32 -1.442695, %v696_v63 }
 0xbed   :  { %1678 = vtanh.f32 %v671_v1  ;;  %v1430_v5 = vmul.f32 -1.442695, %v671_v1 }
 0xbee   :  { %1680 = vpow2.f32 %v1431_v4 }
 0xbef   :  { %1682 = vpow2.f32 %v1430_v5 }
 0xbf6   :  { %v1677_v2 = vpop.eup %1676 }
 0xbf7   :  { %v1679_v3 = vpop.eup %1678  ;;  %709 = vrot.lane.b32.xlu1 %v1677_v2, %s1756_s1 }
 0xbf8   :  { %681 = vrot.lane.b32.xlu0 %v1679_v3, %s1756_s1  ;;  %v1681_v6 = vpop.eup %1680 }
 0xbf9   :  { %v1683_v24 = vpop.eup %1682  ;;  %v700_v7 = vadd.f32 1.0, %v1681_v6 }
 0xbfa   :  { %v675_v9 = vadd.f32 1.0, %v1683_v24 }
 0xbfb   :  { %1684 = vrcp.f32 %v700_v7 }
 0xbfc   :  { %1686 = vrcp.f32 %v675_v9 }
 0xc05   :  { %v1685_v11 = vpop.eup %1684 }
 0xc06   :  { %v1687_v13 = vpop.eup %1686  ;;  %v707_v18 = vmul.f32 %v1685_v11, %v705_v17 }
 0xc07   :  { %v679_v22 = vmul.f32 %v1687_v13, %v1985_v41 }
 0xc69   :  { %v710_v12 = vpop.permute.xlu1 %709 }
 0xc6a   :  { %v712_v14 = vmul.f32 %v1685_v11, %v710_v12  ;;  %v682_v15 = vpop.permute.xlu0 %681 }
 0xc6b   :  { %v684_v16 = vmul.f32 %v1687_v13, %v682_v15 }
 0xc6c   :  { %714 = vrot.lane.b32.xlu1 %v712_v14, %s1757_s0 }
 0xc6d   :  { %686 = vrot.lane.b32.xlu0 %v684_v16, %s1757_s0 }
 0xcde   :  { %v715_v21 = vpop.permute.xlu1 %714 }
 0xcdf   :  { %v2020_v20 = vadd.f32 %v715_v21, %v707_v18  ;;  %v687_v23 = vpop.permute.xlu0 %686 }
 0xce0   :  { %v689_v25 = vadd.f32 %v687_v23, %v679_v22 }
 0xce1   :  { %1688 = vtanh.f32 %v2020_v20  ;;  %v844_v63 = vrot.slane %v2020_v20, 6 }
 0xce2   :  { %1690 = vtanh.f32 %v689_v25 }
 0xceb   :  { %v1689_v26 = vpop.eup %1688 }
 0xcec   :  { %v1691_v27 = vpop.eup %1690  ;;  %720 = vrot.lane.b32.xlu1 %v1689_v26, %s1756_s1 }
 0xced   :  { %692 = vrot.lane.b32.xlu0 %v1691_v27, %s1756_s1 }
 0xd5e   :  { %v721_v10 = vpop.permute.xlu1 %720 }
 0xd5f   :  { %v723_v30 = vmul.f32 %v1685_v11, %v721_v10  ;;  %v693_v31 = vpop.permute.xlu0 %692 }
 0xd60   :  { %v695_v32 = vmul.f32 %v1687_v13, %v693_v31 }
 0xd61   :  { %725 = vrot.lane.b32.xlu0 %v723_v30, %s1757_s0 }
 0xd62   :  { %v1258_v33 = vrot.slane %v695_v32, 2  ;;  %729 = vrot.lane.b32.xlu1 %v695_v32, %s1756_s1 }
 0xd64   :  { %v2029_v36 = vsel %vm1271_vm5, %v1999_v58, %v1258_v33 }
 0xdd3   :  { %v726_v37 = vpop.permute.xlu0 %725 }
 0xdd4   :  { %v730_v38 = vpop.permute.xlu1 %729 }
 0xdd5   :  { %v732_v39 = vsel %vm165_vm1, %v726_v37, %v730_v38 }
 0xdd6   :  { %1432 = vmatmul.mubr.msk.f32.vlgmr.msra.gmra.mrb[4].mxu1 %vm167_vm2, %v732_v39 }
 0xdd7   :  { %1580 = vmatpush1.bf16.msra.mxu1 %v1848_v28  ;;  %1082 = vmatprep.mubr.f32.mxu1 %v1758_v46 }
 0xdd8   :  { %1582 = vmatprep.subr.bf16.mxu1 %v1850_v29 }
 0xddb   :  { %1584 = vmatpush1.bf16.msra.mxu1 %v1867_v34 }
 0xddc   :  { %1586 = vmatprep.subr.bf16.mxu1 %v1871_v35 }
 0xddf   :  { %1588 = vmatpush1.bf16.msra.mxu1 %v1887_v40 }
 0xde0   :  { %1590 = vmatprep.subr.bf16.mxu1 %v1891_v42 }
 0xde3   :  { %1592 = vmatpush1.bf16.msra.mxu1 %v1902_v45 }
 0xea9   :  { %v802_v41 = vpop.f32.mrb[4].mxu1 }
 0xeaa   :  { %v833_v43 = vrot.slane %v802_v41, 6  ;;  %v804_v44 = vpop.f32.mrb[5].mxu1 }
 0xeab   :  { %v807_v47 = vadd.f32 %v1928_v51, %v804_v44 }
 0xeac   :  { %v835_v48 = vadd.f32 %v833_v43, %v1817_v8 }
 0xead   :  { %1692 = vtanh.f32 %v807_v47  ;;  %v1433_v52 = vmul.f32 -1.442695, %v807_v47 }
 0xeae   :  { %1694 = vtanh.f32 %v835_v48  ;;  %v1434_v53 = vmul.f32 -1.442695, %v835_v48 }
 0xeaf   :  { %1696 = vpow2.f32 %v1433_v52 }
 0xeb0   :  { %1698 = vpow2.f32 %v1434_v53 }
 0xeb7   :  { %v1693_v49 = vpop.eup %1692 }
 0xeb8   :  { %v1695_v50 = vpop.eup %1694  ;;  %817 = vrot.lane.b32.xlu0 %v1693_v49, %s1756_s1 }
 0xeb9   :  { %848 = vrot.lane.b32.xlu1 %v1695_v50, %s1756_s1  ;;  %v1697_v54 = vpop.eup %1696 }
 0xeba   :  { %v1699_v55 = vpop.eup %1698  ;;  %v811_v56 = vadd.f32 1.0, %v1697_v54 }
 0xebb   :  { %v839_v57 = vadd.f32 1.0, %v1699_v55 }
 0xebc   :  { %1700 = vrcp.f32 %v811_v56 }
 0xebd   :  { %1702 = vrcp.f32 %v839_v57 }
 0xec6   :  { %v1701_v58 = vpop.eup %1700 }
 0xec7   :  { %v1703_v60 = vpop.eup %1702  ;;  %v815_v0 = vmul.f32 %v1701_v58, %v689_v25 }
 0xec8   :  { %v846_v2 = vmul.f32 %v1703_v60, %v844_v63 }
 0xf2a   :  { %v818_v59 = vpop.permute.xlu0 %817 }
 0xf2b   :  { %v820_v61 = vmul.f32 %v1701_v58, %v818_v59  ;;  %v849_v62 = vpop.permute.xlu1 %848 }
 0xf2c   :  { %v851_v19 = vmul.f32 %v1703_v60, %v849_v62 }
 0xf2d   :  { %822 = vrot.lane.b32.xlu0 %v820_v61, %s1757_s0 }
 0xf2e   :  { %853 = vrot.lane.b32.xlu1 %v851_v19, %s1757_s0 }
 0xf9f   :  { %v823_v1 = vpop.permute.xlu0 %822 }
 0xfa0   :  { %v825_v3 = vadd.f32 %v823_v1, %v815_v0  ;;  %v854_v4 = vpop.permute.xlu1 %853 }
 0xfa1   :  { %v856_v5 = vadd.f32 %v854_v4, %v846_v2 }
 0xfa2   :  { %1704 = vtanh.f32 %v825_v3 }
 0xfa3   :  { %1706 = vtanh.f32 %v856_v5  ;;  %v985_v32 = vrot.slane %v856_v5, 6 }
 0xfac   :  { %v1705_v6 = vpop.eup %1704 }
 0xfad   :  { %v1707_v24 = vpop.eup %1706  ;;  %828 = vrot.lane.b32.xlu0 %v1705_v6, %s1756_s1 }
 0xfae   :  { %859 = vrot.lane.b32.xlu1 %v1707_v24, %s1756_s1 }
0x101f   :  { %v829_v7 = vpop.permute.xlu0 %828 }
0x1020   :  { %v2050_v9 = vmul.f32 %v1701_v58, %v829_v7  ;;  %v860_v11 = vpop.permute.xlu1 %859 }
0x1021   :  { %v862_v12 = vmul.f32 %v1703_v60, %v860_v11 }
0x1022   :  { %v868_v13 = vrot.slane %v2050_v9, 6 }
0x1023   :  { %864 = vrot.lane.b32.xlu0 %v862_v12, %s1757_s0 }
0x1024   :  { %869 = vrot.lane.b32.xlu1 %v868_v13, %s1756_s1 }
0x1095   :  { %v865_v14 = vpop.permute.xlu0 %864 }
0x1096   :  { %v870_v15 = vpop.permute.xlu1 %869 }
0x1097   :  { %v872_v16 = vsel %vm165_vm1, %v865_v14, %v870_v15 }
0x1098   :  { %v874_v17 = vrot.slane %v872_v16, 2 }
0x109a   :  { %1435 = vmatmul.mubr.msk.f32.vlgmr.msra.gmra.mrb[6].mxu0 %vm167_vm2, %v874_v17 }
0x109b   :  { %1596 = vmatpush1.bf16.msra.mxu0 %v1848_v28  ;;  %1223 = vmatprep.mubr.f32.mxu0 %v1758_v46 }
0x109c   :  { %1598 = vmatprep.subr.bf16.mxu0 %v1850_v29 }
0x109f   :  { %1600 = vmatpush1.bf16.msra.mxu0 %v1867_v34 }
0x10a0   :  { %1602 = vmatprep.subr.bf16.mxu0 %v1871_v35 }
0x10a3   :  { %1604 = vmatpush1.bf16.msra.mxu0 %v1887_v40 }
0x10a4   :  { %1606 = vmatprep.subr.bf16.mxu0 %v1891_v42 }
0x10a7   :  { %1608 = vmatpush1.bf16.msra.mxu0 %v1902_v45 }
0x116d   :  { %v943_v18 = vpop.f32.mrb[6].mxu0 }
0x116e   :  { %v974_v21 = vrot.slane %v943_v18, 4  ;;  %v945_v22 = vpop.f32.mrb[7].mxu0 }
0x116f   :  { %v948_v20 = vadd.f32 %v1928_v51, %v945_v22 }
0x1170   :  { %v976_v28 = vadd.f32 %v974_v21, %v1817_v8 }
0x1171   :  { %1708 = vtanh.f32 %v948_v20  ;;  %v1436_v34 = vmul.f32 -1.442695, %v948_v20 }
0x1172   :  { %1710 = vtanh.f32 %v976_v28  ;;  %v1437_v35 = vmul.f32 -1.442695, %v976_v28 }
0x1173   :  { %1712 = vpow2.f32 %v1436_v34 }
0x1174   :  { %1714 = vpow2.f32 %v1437_v35 }
0x117b   :  { %v1709_v29 = vpop.eup %1708 }
0x117c   :  { %v1711_v46 = vpop.eup %1710  ;;  %958 = vrot.lane.b32.xlu0 %v1709_v29, %s1756_s1 }
0x117d   :  { %989 = vrot.lane.b32.xlu1 %v1711_v46, %s1756_s1  ;;  %v1713_v40 = vpop.eup %1712 }
0x117e   :  { %v1715_v42 = vpop.eup %1714  ;;  %v952_v45 = vadd.f32 1.0, %v1713_v40 }
0x117f   :  { %v980_v23 = vadd.f32 1.0, %v1715_v42 }
0x1180   :  { %1716 = vrcp.f32 %v952_v45 }
0x1181   :  { %1718 = vrcp.f32 %v980_v23 }
0x118a   :  { %v1717_v25 = vpop.eup %1716 }
0x118b   :  { %v1719_v27 = vpop.eup %1718  ;;  %v956_v33 = vmul.f32 %v1717_v25, %v825_v3 }
0x118c   :  { %v987_v38 = vmul.f32 %v1719_v27, %v985_v32 }
0x11ee   :  { %v959_v26 = vpop.permute.xlu0 %958 }
0x11ef   :  { %v961_v10 = vmul.f32 %v1717_v25, %v959_v26  ;;  %v990_v30 = vpop.permute.xlu1 %989 }
0x11f0   :  { %v992_v31 = vmul.f32 %v1719_v27, %v990_v30 }
0x11f1   :  { %963 = vrot.lane.b32.xlu0 %v961_v10, %s1757_s0 }
0x11f2   :  { %994 = vrot.lane.b32.xlu1 %v992_v31, %s1757_s0 }
0x1263   :  { %v964_v37 = vpop.permute.xlu0 %963 }
0x1264   :  { %v966_v39 = vadd.f32 %v964_v37, %v956_v33  ;;  %v995_v41 = vpop.permute.xlu1 %994 }
0x1265   :  { %v997_v43 = vadd.f32 %v995_v41, %v987_v38 }
0x1266   :  { %1720 = vtanh.f32 %v966_v39 }
0x1267   :  { %1722 = vtanh.f32 %v997_v43  ;;  %v1126_v13 = vrot.slane %v997_v43, 6 }
0x1270   :  { %v1721_v44 = vpop.eup %1720 }
0x1271   :  { %v1723_v47 = vpop.eup %1722  ;;  %969 = vrot.lane.b32.xlu0 %v1721_v44, %s1756_s1 }
0x1272   :  { %1000 = vrot.lane.b32.xlu1 %v1723_v47, %s1756_s1 }
0x12e3   :  { %v970_v48 = vpop.permute.xlu0 %969 }
0x12e4   :  { %v2073_v49 = vmul.f32 %v1717_v25, %v970_v48  ;;  %v1001_v50 = vpop.permute.xlu1 %1000 }
0x12e5   :  { %v1003_v52 = vmul.f32 %v1719_v27, %v1001_v50  ;;  %v1277_v50 = vld [vmem:[%s2132_s5 + $0x8] sm:$0xff] }
0x12e6   :  { %v1009_v53 = vrot.slane %v2073_v49, 4  ;;  %v1260_v28 = vrot.slane %v2073_v49, 6  ;;  %v1276_v49 = vld [vmem:[%s2132_s5] sm:$0xff] }
0x12e7   :  { %1005 = vrot.lane.b32.xlu0 %v1003_v52, %s1757_s0  ;;  %v1278_v52 = vld [vmem:[%s2132_s5 + $0x10] sm:$0xff] }
0x12e8   :  { %1010 = vrot.lane.b32.xlu1 %v1009_v53, %s1756_s1  ;;  %v1273_v45 = vsel %vm1267_vm3, %v2050_v9, %v1260_v28  ;;  %v1279_v53 = vld [vmem:[%s2132_s5 + $0x18] sm:$0xff] }
0x1359   :  { %v1006_v54 = vpop.permute.xlu0 %1005 }
0x135a   :  { %v1011_v55 = vpop.permute.xlu1 %1010 }
0x135b   :  { %v1013_v56 = vsel %vm165_vm1, %v1006_v54, %v1011_v55  ;;  %v1613_v54 = vpack.c.bf16 %v1279_v53, %v1278_v52 }
0x135c   :  { %v1015_v57 = vrot.slane %v1013_v56, 4 }
0x135e   :  { %1438 = vmatmul.mubr.msk.f32.vlgmr.msra.gmra.mrb[6].mxu1 %vm167_vm2, %v1015_v57 }
0x1431   :  { %v1084_v58 = vpop.f32.mrb[6].mxu1 }
0x1432   :  { %v1115_v59 = vrot.slane %v1084_v58, 2  ;;  %v1086_v60 = vpop.f32.mrb[7].mxu1 }
0x1433   :  { %v1089_v61 = vadd.f32 %v1928_v51, %v1086_v60 }
0x1434   :  { %v1117_v62 = vadd.f32 %v1115_v59, %v1817_v8 }
0x1435   :  { %1724 = vtanh.f32 %v1089_v61  ;;  %v1439_v0 = vmul.f32 -1.442695, %v1089_v61  ;;  %v1443_v61 = vld [vmem:[%s2133_s6] ss:$0 sm:$0xff] }
0x1436   :  { %1726 = vtanh.f32 %v1117_v62  ;;  %v1440_v1 = vmul.f32 -1.442695, %v1117_v62 }
0x1437   :  { %1728 = vpow2.f32 %v1439_v0 }
0x1438   :  { %1730 = vpow2.f32 %v1440_v1 }
0x143f   :  { %v1725_v19 = vpop.eup %1724 }
0x1440   :  { %v1727_v63 = vpop.eup %1726  ;;  %1099 = vrot.lane.b32.xlu0 %v1725_v19, %s1756_s1 }
0x1441   :  { %1130 = vrot.lane.b32.xlu1 %v1727_v63, %s1756_s1  ;;  %v1729_v2 = vpop.eup %1728 }
0x1442   :  { %v1731_v3 = vpop.eup %1730  ;;  %v1093_v4 = vadd.f32 1.0, %v1729_v2 }
0x1443   :  { %v1121_v5 = vadd.f32 1.0, %v1731_v3 }
0x1444   :  { %1732 = vrcp.f32 %v1093_v4 }
0x1445   :  { %1734 = vrcp.f32 %v1121_v5 }
0x144e   :  { %v1733_v6 = vpop.eup %1732 }
0x144f   :  { %v1735_v24 = vpop.eup %1734  ;;  %v1097_v14 = vmul.f32 %v1733_v6, %v966_v39 }
0x1450   :  { %v1128_v16 = vmul.f32 %v1735_v24, %v1126_v13 }
0x14b2   :  { %v1100_v8 = vpop.permute.xlu0 %1099 }
0x14b3   :  { %v1102_v7 = vmul.f32 %v1733_v6, %v1100_v8  ;;  %v1131_v11 = vpop.permute.xlu1 %1130 }
0x14b4   :  { %v1133_v12 = vmul.f32 %v1735_v24, %v1131_v11 }
0x14b5   :  { %1104 = vrot.lane.b32.xlu0 %v1102_v7, %s1757_s0 }
0x14b6   :  { %1135 = vrot.lane.b32.xlu1 %v1133_v12, %s1757_s0  ;;  %v1402_v12 = vlaneseq }
0x1527   :  { %v1105_v15 = vpop.permute.xlu0 %1104 }
0x1528   :  { %v1107_v17 = vadd.f32 %v1105_v15, %v1097_v14  ;;  %v1136_v18 = vpop.permute.xlu1 %1135  ;;  %v1403_v15 = vand.u32 127, %v1402_v12 }
0x1529   :  { %v1138_v21 = vadd.f32 %v1136_v18, %v1128_v16 }
0x152a   :  { %1736 = vtanh.f32 %v1107_v17  ;;  %vm1404_vm6 = vcmp.ge.s32.totalorder %v1403_v15, 32  ;;  %vm1405_vm7 = vcmp.lt.s32.totalorder %v1403_v15, 48 }
0x152b   :  { %1738 = vtanh.f32 %v1138_v21  ;;  %vm1406_vm9 = vmand %vm1404_vm6, %vm1405_vm7 }
0x1534   :  { %v1737_v22 = vpop.eup %1736 }
0x1535   :  { %v1739_v20 = vpop.eup %1738  ;;  %1110 = vrot.lane.b32.xlu0 %v1737_v22, %s1756_s1 }
0x1536   :  { %1141 = vrot.lane.b32.xlu1 %v1739_v20, %s1756_s1 }
0x15a7   :  { %v1111_v29 = vpop.permute.xlu0 %1110 }
0x15a8   :  { %v1113_v46 = vmul.f32 %v1733_v6, %v1111_v29  ;;  %v1142_v34 = vpop.permute.xlu1 %1141 }
0x15a9   :  { %v1144_v35 = vmul.f32 %v1735_v24, %v1142_v34 }
0x15aa   :  { %v1150_v40 = vrot.slane %v1113_v46, 2  ;;  %v1262_v42 = vrot.slane %v1113_v46, 4 }
0x15ab   :  { %1146 = vrot.lane.b32.xlu0 %v1144_v35, %s1757_s0 }
0x15ac   :  { %1151 = vrot.lane.b32.xlu1 %v1150_v40, %s1756_s1  ;;  %v1274_v23 = vsel %vm1269_vm4, %v1273_v45, %v1262_v42 }
0x161d   :  { %v1147_v25 = vpop.permute.xlu0 %1146 }
0x161e   :  { %v1152_v26 = vpop.permute.xlu1 %1151 }
0x161f   :  { %v1154_v27 = vsel %vm165_vm1, %v1147_v25, %v1152_v26 }
0x1620   :  { %v1156_v10 = vrot.slane %v1154_v27, 6 }
0x1622   :  { %1441 = vmatmul.mubr.msk.f32.vlgmr.msra.gmra.mrb[8].mxu0 %vm167_vm2, %v1156_v10 }
0x16f5   :  { %v1225_v30 = vpop.f32.mrb[8].mxu0 }
0x16f6   :  { %v1226_v31 = vpop.f32.mrb[9].mxu0 }
0x16f7   :  { %v1229_v32 = vadd.f32 %v1928_v51, %v1226_v31 }
0x16f9   :  { %1740 = vtanh.f32 %v1229_v32  ;;  %v1442_v9 = vmul.f32 -1.442695, %v1229_v32 }
0x16fb   :  { %1742 = vpow2.f32 %v1442_v9 }
0x1703   :  { %v1741_v33 = vpop.eup %1740 }
0x1704   :  { %1239 = vrot.lane.b32.xlu0 %v1741_v33, %s1756_s1 }
0x1705   :  { %v1743_v37 = vpop.eup %1742 }
0x1706   :  { %v1233_v38 = vadd.f32 1.0, %v1743_v37 }
0x1708   :  { %1744 = vrcp.f32 %v1233_v38 }
0x1712   :  { %v1745_v39 = vpop.eup %1744 }
0x1713   :  { %v1237_v44 = vmul.f32 %v1745_v39, %v1107_v17 }
0x1776   :  { %v1240_v41 = vpop.permute.xlu0 %1239 }
0x1777   :  { %v1242_v43 = vmul.f32 %v1745_v39, %v1240_v41 }
0x1779   :  { %1244 = vrot.lane.b32.xlu1 %v1242_v43, %s1757_s0 }
0x177d   :  { %1289 = vrot.lane.b32.xlu1 %v2029_v36, %s1757_s0  ;;  %v1609_v36 = vpack.c.bf16 %v1277_v50, %v1276_v49 }
0x177f   :  { %1610 = vmatprep.subr.bf16.mxu1 %v1609_v36 }
0x1780   :  { %1612 = vmatpush3.bf16.msra.mxu1 %v1609_v36 }
0x1781   :  { %1614 = vmatprep.subr.bf16.mxu1 %v1613_v54 }
0x1784   :  { %1616 = vmatpush3.bf16.msra.mxu1 %v1613_v54 }
0x17eb   :  { %v1245_v47 = vpop.permute.xlu1 %1244 }
0x17ec   :  { %v1247_v51 = vadd.f32 %v1245_v47, %v1237_v44 }
0x17ee   :  { %1746 = vtanh.f32 %v1247_v51 }
0x17ef   :  { %v1290_v48 = vpop.permute.xlu1 %1289 }
0x17f0   :  { %1474 = vmatprep.mubr.msk.f32.mxu1 %vm165_vm1, %v1290_v48 }
0x17f8   :  { %v1747_v55 = vpop.eup %1746 }
0x17f9   :  { %1250 = vrot.lane.b32.xlu0 %v1747_v55, %s1756_s1 }
0x186b   :  { %v1251_v56 = vpop.permute.xlu0 %1250 }
0x186c   :  { %v1253_v57 = vmul.f32 %v1745_v39, %v1251_v56 }
0x186e   :  { %v1265_v58 = vrot.slane %v1253_v57, 2 }
0x1870   :  { %v1275_v59 = vsel %vm1271_vm5, %v1274_v23, %v1265_v58 }
0x1871   :  { %1291 = vrot.lane.b32.xlu0 %v1275_v59, %s1757_s0 }
0x18e3   :  { %v1292_v60 = vpop.permute.xlu0 %1291 }
0x18e4   :  { %1475 = vmatmul.mubr.msk.f32.vlgmr.msra.gmra.mrb[8].mxu1 %vm165_vm1, %v1292_v60 }
0x19b7   :  { %v1476_v62 = vpop.f32.mrb[8].mxu1 }
0x19b8   :  { %v1369_v19 = vadd.f32 %v1476_v62, %v1443_v61  ;;  %v1363_v63 = vpop.f32.mrb[9].mxu1 }
0x19b9   :  { %v1364_v0 = vadd.f32 %v1443_v61, %v1363_v63 }
0x19ba   :  { %v1375_v1 = vand.u32 2147483647, %v1369_v19  ;;  %v1373_v46 = vmax.f32 %v1369_v19, 0.0 }
0x19bb   :  { %v1374_v2 = vand.u32 2147483647, %v1364_v0  ;;  %v1372_v42 = vmax.f32 %v1364_v0, 0.0 }
0x19bc   :  { %v1377_v3 = vsub.f32 0.0, %v1375_v1 }
0x19bd   :  { %v1376_v4 = vsub.f32 0.0, %v1374_v2 }
0x19be   :  { %v1380_v5 = vmul.f32 1.442695, %v1377_v3 }
0x19bf   :  { %v1378_v6 = vmul.f32 1.442695, %v1376_v4 }
0x19c0   :  { %1748 = vpow2.f32 %v1380_v5 }
0x19c1   :  { %1750 = vpow2.f32 %v1378_v6 }
0x19ca   :  { %v1749_v8 = vpop.eup %1748 }
0x19cb   :  { %v1751_v24 = vpop.eup %1750  ;;  %v1391_v7 = vadd.f32 1.0, %v1749_v8  ;;  %v1394_v13 = vmul.f32 -0.5, %v1749_v8  ;;  %v1397_v17 = vand.u32 2147483647, %v1749_v8 }
0x19cc   :  { %v1382_v11 = vadd.f32 1.0, %v1751_v24  ;;  %v1385_v14 = vmul.f32 -0.5, %v1751_v24  ;;  %v1388_v21 = vand.u32 2147483647, %v1751_v24 }
0x19cd   :  { %1752 = vlog2.f32 %v1391_v7  ;;  %v1395_v16 = vadd.f32 1.0, %v1394_v13  ;;  %vm1398_vm8 = vcmp.lt.f32.partialorder %v1397_v17, 0.0004427343 }
0x19ce   :  { %1754 = vlog2.f32 %v1382_v11  ;;  %v1386_v18 = vadd.f32 1.0, %v1385_v14  ;;  %vm1389_vm10 = vcmp.lt.f32.partialorder %v1388_v21, 0.0004427343 }
0x19cf   :  { %v1396_v29 = vmul.f32 %v1749_v8, %v1395_v16 }
0x19d0   :  { %v1387_v35 = vmul.f32 %v1751_v24, %v1386_v18 }
0x19d7   :  { %v1753_v22 = vpop.eup %1752 }
0x19d8   :  { %v1755_v20 = vpop.eup %1754  ;;  %v1393_v28 = vmul.f32 0.6931472, %v1753_v22 }
0x19d9   :  { %v1384_v34 = vmul.f32 0.6931472, %v1755_v20 }
0x19da   :  { %v1399_v40 = vsel %vm1398_vm8, %v1396_v29, %v1393_v28 }
0x19db   :  { %v1401_v45 = vadd.f32 %v1399_v40, %v1373_v46  ;;  %v1390_v23 = vsel %vm1389_vm10, %v1387_v35, %v1384_v34 }
0x19dc   :  { %v1400_v25 = vadd.f32 %v1390_v23, %v1372_v42 }
0x19dd   :  { %v1408_v26 = vsel %vm1406_vm9, %v1401_v45, %v1369_v19 }
0x19de   :  { %1410 = vst [vmem:[%s2134_s7 + $0x8] sm:$0xff] %v1408_v26  ;;  %v1407_v27 = vsel %vm1406_vm9, %v1400_v25, %v1364_v0 }
0x19df   :  { %1409 = vst [vmem:[%s2134_s7] sm:$0xff] %v1407_v27 }

</bundles_post_ra>
